<compile_context>
chip_gen: v7x
topology: tpu7x:2x2x1
jax: 0.10.0
libtpu: 0.0.40
codegen_flags: <defaults>
</compile_context>

<pallas_src>
import functools

import jax
import jax.numpy as jnp
from jax.experimental import pallas as pl
from jax.experimental.pallas import tpu as pltpu


def _round_up(x, m):
    return ((x + m - 1) // m) * m


# ---------------------------------------------------------------------------
# Fused Pallas kernel: full TCN forward for `bt` batch elements per grid step.
# ---------------------------------------------------------------------------
def _fused_tcn_kernel(x_ref, w_ref, b_ref, o_ref, act_ref, *,
                      blocks_cfg, last_cfg, T, margin, bt, c_max):
    """refs:
         x_ref   : (bt, C_in0, T)      f32   input block
         w_ref   : (WR, Wcols)         bf16  packed im2col weights
         b_ref   : (BR, 1)             f32   packed biases
         o_ref   : (bt, O_pad, T)      f32   output block
         act_ref : (c_max, frame_w)    f32   zero-margined activation frame
    """
    seg = T + margin
    starts = tuple(margin + b * seg for b in range(bt))

    # Zero ONLY the margin stripes (the central windows are always overwritten
    # by each conv's own store before being read).  Per grid step on purpose:
    # a program_id==0 one-time zero would be wrong on v7x megacore.
    for s in range(bt + 1):
        m0 = s * seg
        act_ref[:, m0:m0 + margin] = jnp.zeros((c_max, margin), jnp.float32)

    def load_w(r0, rows, cols):
        return w_ref[r0:r0 + rows, 0:cols]

    def load_b(r0, rows):
        return b_ref[r0:r0 + rows, :]

    def gather_input(h):
        # Block input as a value (C_in0, bt*T) (identity residual fallback).
        if h is not None:
            return h
        if bt == 1:
            return x_ref[0].astype(jnp.float32)
        return jnp.concatenate([x_ref[b] for b in range(bt)],
                               axis=1).astype(jnp.float32)

    def dilated_matmul(h, wr0, rows, cols, br0, K, c_in, dil, pad):
        # 1) place each batch window in its zero-margined frame segment
        #    (aligned stores; margins implement the symmetric "same" padding)
        for b in range(bt):
            src = x_ref[b] if h is None else h[:, b * T:(b + 1) * T]
            act_ref[0:c_in, starts[b]:starts[b] + T] = src
        # 2) im2col: K dilated taps x bt batch windows -> (K*c_in, bt*T),
        #    gathered as values (no f32 scratch round-trip), cast to bf16 once.
        taps = []
        for k in range(K):
            off = -pad + k * dil
            pieces = [act_ref[0:c_in, starts[b] + off:starts[b] + off + T]
                      for b in range(bt)]
            taps.append(pieces[0] if bt == 1
                        else jnp.concatenate(pieces, axis=1))
        slab = (taps[0] if K == 1
                else jnp.concatenate(taps, axis=0)).astype(jnp.bfloat16)
        # 3) one fat MXU matmul (bf16 x bf16 -> f32) + f32 bias
        y = jnp.dot(load_w(wr0, rows, cols), slab,
                    preferred_element_type=jnp.float32)
        return y + load_b(br0, rows)

    h = None  # None means "the network input x" (read per batch from x_ref)
    for (conv_specs, down_mode, down_spec, c_out) in blocks_cfg:
        block_in = h
        res = h
        for j, (wr0, rows, cols, br0, K, c_in, dil, pad) in enumerate(conv_specs):
            y = dilated_matmul(h, wr0, rows, cols, br0, K, c_in, dil, pad)
            if j == 0 and down_mode == "fused":
                res = y[c_out:rows]      # 1x1 downsample rows (bias included)
                y = y[0:c_out]
            h = jnp.maximum(y, 0.0)
        if down_mode == "separate":      # generic fallback (even kernel_size)
            wr0d, rowsd, colsd, br0d = down_spec
            res = jnp.dot(load_w(wr0d, rowsd, colsd),
                          gather_input(block_in).astype(jnp.bfloat16),
                          preferred_element_type=jnp.float32
                          ) + load_b(br0d, rowsd)
        elif down_mode == "none" and res is None:
            res = gather_input(block_in)  # identity residual from x
        h = jnp.maximum(h + res, 0.0)     # fused residual add + ReLU

    # Final Linear(C_last -> output_size) as a 1x1 conv over all bt*T lanes.
    wr0, rows, cols, br0 = last_cfg
    y = jnp.dot(load_w(wr0, rows, cols), h.astype(jnp.bfloat16),
                preferred_element_type=jnp.float32) + load_b(br0, rows)
    for b in range(bt):
        o_ref[b] = y[:, b * T:(b + 1) * T].astype(o_ref.dtype)


# ---------------------------------------------------------------------------
# Wrapper: parameter packing (2 slabs) + single pallas_call.
# ---------------------------------------------------------------------------
def tcn_forward(params, x, *, kernel_size, num_of_convs, batch_tile=None):
    """x: (B, C_in, T) -> (B, T, output_size)   (mask=None inference path).

    batch_tile: batch elements folded into the lane axis per grid step.
      Default = B (grid collapses to one step; fills the 256-wide MXU).
      On v7x with B >= 2 you may prefer batch_tile = B // 2 to keep a size-2
      "parallel" grid axis sharded across the two TensorCores.
    """
    B, c_in0, T = x.shape
    K = kernel_size
    bt = B if batch_tile is None else batch_tile
    assert B % bt == 0 and bt >= 1

    W_ALIGN = 16   # bf16 packs 16 sublanes per vreg -> keep row offsets aligned
    B_ALIGN = 8

    w_chunks, b_chunks = [], []
    w_cursor = 0
    b_cursor = 0
    max_cols = 1

    def add_weight(mat_f32):
        nonlocal w_cursor, max_cols
        rows, cols = mat_f32.shape
        max_cols = max(max_cols, cols)
        r0 = w_cursor
        w_chunks.append(mat_f32)
        w_cursor += _round_up(rows, W_ALIGN)
        return r0, rows, cols

    def add_bias(vec_f32):
        nonlocal b_cursor
        rows = vec_f32.shape[0]
        r0 = b_cursor
        b_chunks.append(vec_f32)
        b_cursor += _round_up(rows, B_ALIGN)
        return r0

    blocks_cfg = []
    c_max = c_in0
    pad_max = 0
    for i, blk in enumerate(params["blocks"]):
        dilation = 2 ** i
        assert (K - 1) * dilation % 2 == 0, (
            "symmetric 'same' padding requires (kernel_size-1)*dilation even")
        pad = (K - 1) * dilation // 2
        pad_max = max(pad_max, pad)
        has_down = blk["down_w"] is not None
        fuse_down = has_down and (pad % dilation == 0)   # central tap exists
        c_out = blk["conv_w"][0].shape[1]
        conv_specs = []
        for j in range(num_of_convs):
            w = blk["conv_w"][j]                          # (K, C_out, C_in)
            _, co, ci = w.shape
            c_max = max(c_max, ci, co)
            # im2col weight: (C_out, K*C_in), channel fastest within each tap
            wf = jnp.transpose(w, (1, 0, 2)).reshape(co, K * ci)
            bias = blk["conv_b"][j]                       # (co, 1)
            if j == 0 and fuse_down:
                # Fuse the 1x1 downsample as extra output rows whose
                # coefficients sit only in the central-tap column group.
                kc = pad // dilation
                dw = blk["down_w"][0]                     # (co, ci)
                df = jnp.zeros((co, K * ci), jnp.float32).at[
                    :, kc * ci:(kc + 1) * ci].set(dw)
                wf = jnp.concatenate([wf, df], axis=0)    # (2*co, K*ci)
                bias = jnp.concatenate([bias, blk["down_b"]], axis=0)
            wr0, rows, cols = add_weight(wf.astype(jnp.float32))
            br0 = add_bias(bias.astype(jnp.float32))
            conv_specs.append((wr0, rows, cols, br0, K, ci, dilation, pad))
        down_spec = None
        if has_down and not fuse_down:                    # generic fallback
            wr0d, rowsd, colsd = add_weight(blk["down_w"][0].astype(jnp.float32))
            br0d = add_bias(blk["down_b"].astype(jnp.float32))
            down_spec = (wr0d, rowsd, colsd, br0d)
        down_mode = "fused" if fuse_down else ("separate" if has_down else "none")
        blocks_cfg.append((tuple(conv_specs), down_mode, down_spec, c_out))

    # Final linear, output channels zero-padded to >=8 sublanes.
    wl = params["last_w"][0]                              # (O, C_last)
    bl = params["last_b"]                                 # (O, 1)
    out_size, c_last = wl.shape
    o_pad = _round_up(max(out_size, 8), 8)
    wl_p = jnp.zeros((o_pad, c_last), jnp.float32).at[:out_size].set(wl)
    bl_p = jnp.zeros((o_pad, 1), jnp.float32).at[:out_size].set(bl)
    wr0, rows, cols = add_weight(wl_p)
    br0 = add_bias(bl_p)
    last_cfg = (wr0, rows, cols, br0)

    # Pack all weights into one bf16 slab, all biases into one f32 slab.
    slab_cols = _round_up(max(max_cols, 128), 128)
    w_slab = jnp.zeros((max(w_cursor, W_ALIGN), slab_cols), jnp.float32)
    r = 0
    for mat in w_chunks:
        rr, cc = mat.shape
        w_slab = w_slab.at[r:r + rr, :cc].set(mat)
        r += _round_up(rr, W_ALIGN)
    w_slab = w_slab.astype(jnp.bfloat16)

    b_slab = jnp.zeros((max(b_cursor, B_ALIGN), 1), jnp.float32)
    r = 0
    for vec in b_chunks:
        rr = vec.shape[0]
        b_slab = b_slab.at[r:r + rr, :].set(vec)
        r += _round_up(rr, B_ALIGN)

    c_max = _round_up(c_max, 8)
    margin = max(128, _round_up(pad_max, 128))   # 128-aligned zero margins
    seg = T + margin
    frame_w = bt * seg + margin

    # VMEM scaling guard (v7x: 64 MiB physical, 32 MiB scoped default).
    vmem_est = (4 * c_max * frame_w                       # activation frame
                + 2 * 4 * bt * (c_in0 + o_pad) * T        # x / out blocks (x2)
                + 2 * int(w_slab.size) + 4 * int(b_slab.size)
                + 6 * K * c_max * bt * T)                 # in-kernel im2col temps
    assert vmem_est < 24 * 1024 * 1024, (
        "per-step VMEM footprint too large; tile T with an inner loop or "
        "reduce batch_tile")  # TODO(synk): T-tiling path for very long sequences

    kernel = functools.partial(
        _fused_tcn_kernel,
        blocks_cfg=tuple(blocks_cfg), last_cfg=last_cfg,
        T=T, margin=margin, bt=bt, c_max=c_max)

    out = pl.pallas_call(
        kernel,
        out_shape=jax.ShapeDtypeStruct((B, o_pad, T), jnp.float32),
        grid=(B // bt,),
        in_specs=[
            pl.BlockSpec((bt, c_in0, T), lambda i: (i, 0, 0)),
            pl.BlockSpec(w_slab.shape, lambda i: (0, 0)),
            pl.BlockSpec(b_slab.shape, lambda i: (0, 0)),
        ],
        out_specs=pl.BlockSpec((bt, o_pad, T), lambda i: (i, 0, 0)),
        scratch_shapes=[
            pltpu.VMEM((c_max, frame_w), jnp.float32),   # zero-margined frame
        ],
        compiler_params=pltpu.CompilerParams(
            dimension_semantics=("parallel",)),
    )(x.astype(jnp.float32), w_slab, b_slab)

    # Slice off padded channels + permute(0, 2, 1): tiny, leave to XLA.
    return jnp.transpose(out[:, :out_size, :], (0, 2, 1)).astype(jnp.float32)


# ---------------------------------------------------------------------------
# Pure-JAX reference (f32) for a sanity check.
# ---------------------------------------------------------------------------
def _conv1d_ref(x, w, b, dilation, padding):
    K = w.shape[0]
    T = x.shape[2]
    xp = jnp.pad(x, ((0, 0), (0, 0), (padding, padding)))
    y = sum(jnp.einsum("oc,bct->bot", w[k],
                       xp[:, :, k * dilation:k * dilation + T])
            for k in range(K))
    return y + b[None]


def tcn_forward_ref(params, x, *, kernel_size, num_of_convs):
    out = x
    for i, blk in enumerate(params["blocks"]):
        dilation = 2 ** i
        padding = (kernel_size - 1) * dilation // 2
        res_in = out
        h = out
        for j in range(num_of_convs):
            h = jnp.maximum(
                _conv1d_ref(h, blk["conv_w"][j], blk["conv_b"][j],
                            dilation, padding), 0.0)
        if blk["down_w"] is not None:
            res = _conv1d_ref(res_in, blk["down_w"], blk["down_b"], 1, 0)
        else:
            res = res_in
        out = jnp.maximum(h + res, 0.0)
    y = _conv1d_ref(out, params["last_w"], params["last_b"], 1, 0)
    return jnp.transpose(y, (0, 2, 1)).astype(jnp.float32)


# ---------------------------------------------------------------------------
# Parameter init (deterministic, synthetic)
# ---------------------------------------------------------------------------
def init_tcn_params(key, input_size, output_size, num_channels, num_of_convs,
                    kernel_size):
    params = {"blocks": []}
    for i, out_ch in enumerate(num_channels):
        in_ch = input_size if i == 0 else num_channels[i - 1]
        blk = {"conv_w": [], "conv_b": [], "down_w": None, "down_b": None}
        for j in range(num_of_convs):
            cin = in_ch if j == 0 else out_ch
            key, k1, k2 = jax.random.split(key, 3)
            # stored as (K, C_out, C_in) (PyTorch Conv1d weight is (C_out,C_in,K))
            blk["conv_w"].append(
                0.1 * jax.random.normal(k1, (kernel_size, out_ch, cin),
                                        jnp.float32))
            blk["conv_b"].append(
                0.1 * jax.random.normal(k2, (out_ch, 1), jnp.float32))
        if in_ch != out_ch:  # 1x1 downsample conv for the residual branch
            key, k1, k2 = jax.random.split(key, 3)
            blk["down_w"] = 0.1 * jax.random.normal(k1, (1, out_ch, in_ch),
                                                    jnp.float32)
            blk["down_b"] = 0.1 * jax.random.normal(k2, (out_ch, 1),
                                                    jnp.float32)
        params["blocks"].append(blk)
    key, k1, k2 = jax.random.split(key, 3)
    # last layer: Linear(num_channels[-1], output_size) == 1x1 conv
    params["last_w"] = 0.1 * jax.random.normal(
        k1, (1, output_size, num_channels[-1]), jnp.float32)
    params["last_b"] = 0.1 * jax.random.normal(k2, (output_size, 1),
                                               jnp.float32)
    return params


# ---------------------------------------------------------------------------
if __name__ == "__main__":
    B = 2
    INPUT_SIZE = 8          # input channels
    T = 128                 # temporal length
    NUM_CHANNELS = [16, 16]
    NUM_OF_CONVS = 2
    KERNEL_SIZE = 7
    OUTPUT_SIZE = 4

    key = jax.random.PRNGKey(0)
    key, xk = jax.random.split(key)
    x = jax.random.normal(xk, (B, INPUT_SIZE, T), jnp.float32)

    params = init_tcn_params(key, INPUT_SIZE, OUTPUT_SIZE, NUM_CHANNELS,
                             NUM_OF_CONVS, KERNEL_SIZE)

    fwd = jax.jit(
        functools.partial(tcn_forward, kernel_size=KERNEL_SIZE,
                          num_of_convs=NUM_OF_CONVS))
    out = fwd(params, x)
    jax.block_until_ready(out)
    assert out.shape == (B, T, OUTPUT_SIZE), out.shape
    assert out.dtype == jnp.float32

    # Sanity check against the pure-JAX f32 reference (bf16 MXU inputs in the
    # kernel -> loose tolerance, accumulation is f32).
    ref = tcn_forward_ref(params, x, kernel_size=KERNEL_SIZE,
                          num_of_convs=NUM_OF_CONVS)
    err = float(jnp.max(jnp.abs(out - ref)))
    assert err < 1e-1, f"max abs err vs reference: {err}"

    print("KERNEL_OK")
</pallas_src>

<mosaic_0001>
module attributes {stable_mosaic.version = 11 : i64} {
  func.func @_fused_tcn_kernel(%arg0: i32, %arg1: memref<2x8x128xf32, #tpu.memory_space<vmem>>, %arg2: memref<96x128xbf16, #tpu.memory_space<vmem>>, %arg3: memref<88x1xf32, #tpu.memory_space<vmem>>, %arg4: memref<2x8x128xf32, #tpu.memory_space<vmem>>, %arg5: memref<16x640xf32, #tpu.memory_space<vmem>>) attributes {dimension_semantics = [#tpu.dimension_semantics<parallel>], iteration_bounds = array<i64: 1>, scalar_prefetch = 0 : i64, scratch_operands = 1 : i64, tpu.core_type = #tpu.core_type<tc>, window_params = [{transform_indices = @transform_0, window_bounds = array<i64: 2, 8, 128>}, {pipeline_mode = #tpu.pipeline_mode<synchronous>, transform_indices = @transform_1, window_bounds = array<i64: 96, 128>}, {pipeline_mode = #tpu.pipeline_mode<synchronous>, transform_indices = @transform_2, window_bounds = array<i64: 88, 1>}, {transform_indices = @transform_3, window_bounds = array<i64: 2, 8, 128>}]} {
    %cst = arith.constant 0.000000e+00 : f32
    %0 = vector.broadcast %cst : f32 to vector<16x128xf32>
    %c0 = arith.constant 0 : index
    %c0_0 = arith.constant 0 : index
    %1 = vector.load %arg5[%c0, %c0_0] : memref<16x640xf32, #tpu.memory_space<vmem>>, vector<16x128xf32>
    tpu.vector_store %arg5[%c0, %c0_0], %0 {strides = array<i32>} : memref<16x640xf32, #tpu.memory_space<vmem>>, vector<16x128xf32>,
    %cst_1 = arith.constant 0.000000e+00 : f32
    %2 = vector.broadcast %cst_1 : f32 to vector<16x128xf32>
    %c0_2 = arith.constant 0 : index
    %c256 = arith.constant 256 : index
    %3 = vector.load %arg5[%c0_2, %c256] : memref<16x640xf32, #tpu.memory_space<vmem>>, vector<16x128xf32>
    tpu.vector_store %arg5[%c0_2, %c256], %2 {strides = array<i32>} : memref<16x640xf32, #tpu.memory_space<vmem>>, vector<16x128xf32>,
    %cst_3 = arith.constant 0.000000e+00 : f32
    %4 = vector.broadcast %cst_3 : f32 to vector<16x128xf32>
    %c0_4 = arith.constant 0 : index
    %c512 = arith.constant 512 : index
    %5 = vector.load %arg5[%c0_4, %c512] : memref<16x640xf32, #tpu.memory_space<vmem>>, vector<16x128xf32>
    tpu.vector_store %arg5[%c0_4, %c512], %4 {strides = array<i32>} : memref<16x640xf32, #tpu.memory_space<vmem>>, vector<16x128xf32>,
    %c0_5 = arith.constant 0 : index
    %c0_6 = arith.constant 0 : index
    %c0_7 = arith.constant 0 : index
    %6 = vector.load %arg1[%c0_5, %c0_6, %c0_7] : memref<2x8x128xf32, #tpu.memory_space<vmem>>, vector<1x8x128xf32>
    %7 = vector.shape_cast %6 : vector<1x8x128xf32> to vector<8x128xf32>
    %c0_8 = arith.constant 0 : index
    %c128 = arith.constant 128 : index
    %8 = vector.load %arg5[%c0_8, %c128] : memref<16x640xf32, #tpu.memory_space<vmem>>, vector<8x128xf32>
    tpu.vector_store %arg5[%c0_8, %c128], %7 {strides = array<i32>} : memref<16x640xf32, #tpu.memory_space<vmem>>, vector<8x128xf32>,
    %c1 = arith.constant 1 : index
    %c0_9 = arith.constant 0 : index
    %c0_10 = arith.constant 0 : index
    %9 = vector.load %arg1[%c1, %c0_9, %c0_10] : memref<2x8x128xf32, #tpu.memory_space<vmem>>, vector<1x8x128xf32>
    %10 = vector.shape_cast %9 : vector<1x8x128xf32> to vector<8x128xf32>
    %c0_11 = arith.constant 0 : index
    %c384 = arith.constant 384 : index
    %11 = vector.load %arg5[%c0_11, %c384] : memref<16x640xf32, #tpu.memory_space<vmem>>, vector<8x128xf32>
    tpu.vector_store %arg5[%c0_11, %c384], %10 {strides = array<i32>} : memref<16x640xf32, #tpu.memory_space<vmem>>, vector<8x128xf32>,
    %c0_12 = arith.constant 0 : index
    %c125 = arith.constant 125 : index
    %12 = vector.load %arg5[%c0_12, %c125] : memref<16x640xf32, #tpu.memory_space<vmem>>, vector<8x128xf32>
    %c0_13 = arith.constant 0 : index
    %c381 = arith.constant 381 : index
    %13 = vector.load %arg5[%c0_13, %c381] : memref<16x640xf32, #tpu.memory_space<vmem>>, vector<8x128xf32>
    %14 = tpu.concatenate %12, %13 in 1 : vector<8x128xf32>, vector<8x128xf32> -> vector<8x256xf32>
    %c0_14 = arith.constant 0 : index
    %c126 = arith.constant 126 : index
    %15 = vector.load %arg5[%c0_14, %c126] : memref<16x640xf32, #tpu.memory_space<vmem>>, vector<8x128xf32>
    %c0_15 = arith.constant 0 : index
    %c382 = arith.constant 382 : index
    %16 = vector.load %arg5[%c0_15, %c382] : memref<16x640xf32, #tpu.memory_space<vmem>>, vector<8x128xf32>
    %17 = tpu.concatenate %15, %16 in 1 : vector<8x128xf32>, vector<8x128xf32> -> vector<8x256xf32>
    %c0_16 = arith.constant 0 : index
    %c127 = arith.constant 127 : index
    %18 = vector.load %arg5[%c0_16, %c127] : memref<16x640xf32, #tpu.memory_space<vmem>>, vector<8x128xf32>
    %c0_17 = arith.constant 0 : index
    %c383 = arith.constant 383 : index
    %19 = vector.load %arg5[%c0_17, %c383] : memref<16x640xf32, #tpu.memory_space<vmem>>, vector<8x128xf32>
    %20 = tpu.concatenate %18, %19 in 1 : vector<8x128xf32>, vector<8x128xf32> -> vector<8x256xf32>
    %c0_18 = arith.constant 0 : index
    %c128_19 = arith.constant 128 : index
    %21 = vector.load %arg5[%c0_18, %c128_19] : memref<16x640xf32, #tpu.memory_space<vmem>>, vector<8x128xf32>
    %c0_20 = arith.constant 0 : index
    %c384_21 = arith.constant 384 : index
    %22 = vector.load %arg5[%c0_20, %c384_21] : memref<16x640xf32, #tpu.memory_space<vmem>>, vector<8x128xf32>
    %23 = tpu.concatenate %21, %22 in 1 : vector<8x128xf32>, vector<8x128xf32> -> vector<8x256xf32>
    %c0_22 = arith.constant 0 : index
    %c129 = arith.constant 129 : index
    %24 = vector.load %arg5[%c0_22, %c129] : memref<16x640xf32, #tpu.memory_space<vmem>>, vector<8x128xf32>
    %c0_23 = arith.constant 0 : index
    %c385 = arith.constant 385 : index
    %25 = vector.load %arg5[%c0_23, %c385] : memref<16x640xf32, #tpu.memory_space<vmem>>, vector<8x128xf32>
    %26 = tpu.concatenate %24, %25 in 1 : vector<8x128xf32>, vector<8x128xf32> -> vector<8x256xf32>
    %c0_24 = arith.constant 0 : index
    %c130 = arith.constant 130 : index
    %27 = vector.load %arg5[%c0_24, %c130] : memref<16x640xf32, #tpu.memory_space<vmem>>, vector<8x128xf32>
    %c0_25 = arith.constant 0 : index
    %c386 = arith.constant 386 : index
    %28 = vector.load %arg5[%c0_25, %c386] : memref<16x640xf32, #tpu.memory_space<vmem>>, vector<8x128xf32>
    %29 = tpu.concatenate %27, %28 in 1 : vector<8x128xf32>, vector<8x128xf32> -> vector<8x256xf32>
    %c0_26 = arith.constant 0 : index
    %c131 = arith.constant 131 : index
    %30 = vector.load %arg5[%c0_26, %c131] : memref<16x640xf32, #tpu.memory_space<vmem>>, vector<8x128xf32>
    %c0_27 = arith.constant 0 : index
    %c387 = arith.constant 387 : index
    %31 = vector.load %arg5[%c0_27, %c387] : memref<16x640xf32, #tpu.memory_space<vmem>>, vector<8x128xf32>
    %32 = tpu.concatenate %30, %31 in 1 : vector<8x128xf32>, vector<8x128xf32> -> vector<8x256xf32>
    %33 = tpu.concatenate %14, %17, %20, %23, %26, %29, %32 in 0 : vector<8x256xf32>, vector<8x256xf32>, vector<8x256xf32>, vector<8x256xf32>, vector<8x256xf32>, vector<8x256xf32>, vector<8x256xf32> -> vector<56x256xf32>
    %34 = arith.truncf %33 : vector<56x256xf32> to vector<56x256xbf16>
    %c0_28 = arith.constant 0 : index
    %c0_29 = arith.constant 0 : index
    %35 = vector.load %arg2[%c0_28, %c0_29] : memref<96x128xbf16, #tpu.memory_space<vmem>>, vector<32x56xbf16>
    %cst_30 = arith.constant dense<0.000000e+00> : vector<32x256xf32>
    %36 = tpu.matmul %35, %34, %cst_30 {dimension_numbers = #tpu.dot_dimension_numbers<[1], [0], [0], [1], [0, 0, 1, 1], [], []>} : vector<32x56xbf16>, vector<56x256xbf16>, vector<32x256xf32> -> vector<32x256xf32>
    %c0_31 = arith.constant 0 : index
    %c0_32 = arith.constant 0 : index
    %37 = vector.load %arg3[%c0_31, %c0_32] : memref<88x1xf32, #tpu.memory_space<vmem>>, vector<32x1xf32>
    %38 = vector.broadcast %37 : vector<32x1xf32> to vector<32x256xf32>
    %39 = arith.addf %36, %38 : vector<32x256xf32>
    %40 = vector.extract_strided_slice %39 {offsets = [16, 0], sizes = [16, 256], strides = [1, 1]} : vector<32x256xf32> to vector<16x256xf32>
    %41 = vector.extract_strided_slice %39 {offsets = [0, 0], sizes = [16, 256], strides = [1, 1]} : vector<32x256xf32> to vector<16x256xf32>
    %cst_33 = arith.constant 0.000000e+00 : f32
    %42 = vector.broadcast %cst_33 : f32 to vector<16x256xf32>
    %43 = arith.maximumf %41, %42 : vector<16x256xf32>
    %44 = vector.extract_strided_slice %43 {offsets = [0, 0], sizes = [16, 128], strides = [1, 1]} : vector<16x256xf32> to vector<16x128xf32>
    %c0_34 = arith.constant 0 : index
    %c128_35 = arith.constant 128 : index
    %45 = vector.load %arg5[%c0_34, %c128_35] : memref<16x640xf32, #tpu.memory_space<vmem>>, vector<16x128xf32>
    tpu.vector_store %arg5[%c0_34, %c128_35], %44 {strides = array<i32>} : memref<16x640xf32, #tpu.memory_space<vmem>>, vector<16x128xf32>,
    %46 = vector.extract_strided_slice %43 {offsets = [0, 128], sizes = [16, 128], strides = [1, 1]} : vector<16x256xf32> to vector<16x128xf32>
    %c0_36 = arith.constant 0 : index
    %c384_37 = arith.constant 384 : index
    %47 = vector.load %arg5[%c0_36, %c384_37] : memref<16x640xf32, #tpu.memory_space<vmem>>, vector<16x128xf32>
    tpu.vector_store %arg5[%c0_36, %c384_37], %46 {strides = array<i32>} : memref<16x640xf32, #tpu.memory_space<vmem>>, vector<16x128xf32>,
    %c0_38 = arith.constant 0 : index
    %c125_39 = arith.constant 125 : index
    %48 = vector.load %arg5[%c0_38, %c125_39] : memref<16x640xf32, #tpu.memory_space<vmem>>, vector<16x128xf32>
    %c0_40 = arith.constant 0 : index
    %c381_41 = arith.constant 381 : index
    %49 = vector.load %arg5[%c0_40, %c381_41] : memref<16x640xf32, #tpu.memory_space<vmem>>, vector<16x128xf32>
    %50 = tpu.concatenate %48, %49 in 1 : vector<16x128xf32>, vector<16x128xf32> -> vector<16x256xf32>
    %c0_42 = arith.constant 0 : index
    %c126_43 = arith.constant 126 : index
    %51 = vector.load %arg5[%c0_42, %c126_43] : memref<16x640xf32, #tpu.memory_space<vmem>>, vector<16x128xf32>
    %c0_44 = arith.constant 0 : index
    %c382_45 = arith.constant 382 : index
    %52 = vector.load %arg5[%c0_44, %c382_45] : memref<16x640xf32, #tpu.memory_space<vmem>>, vector<16x128xf32>
    %53 = tpu.concatenate %51, %52 in 1 : vector<16x128xf32>, vector<16x128xf32> -> vector<16x256xf32>
    %c0_46 = arith.constant 0 : index
    %c127_47 = arith.constant 127 : index
    %54 = vector.load %arg5[%c0_46, %c127_47] : memref<16x640xf32, #tpu.memory_space<vmem>>, vector<16x128xf32>
    %c0_48 = arith.constant 0 : index
    %c383_49 = arith.constant 383 : index
    %55 = vector.load %arg5[%c0_48, %c383_49] : memref<16x640xf32, #tpu.memory_space<vmem>>, vector<16x128xf32>
    %56 = tpu.concatenate %54, %55 in 1 : vector<16x128xf32>, vector<16x128xf32> -> vector<16x256xf32>
    %c0_50 = arith.constant 0 : index
    %c128_51 = arith.constant 128 : index
    %57 = vector.load %arg5[%c0_50, %c128_51] : memref<16x640xf32, #tpu.memory_space<vmem>>, vector<16x128xf32>
    %c0_52 = arith.constant 0 : index
    %c384_53 = arith.constant 384 : index
    %58 = vector.load %arg5[%c0_52, %c384_53] : memref<16x640xf32, #tpu.memory_space<vmem>>, vector<16x128xf32>
    %59 = tpu.concatenate %57, %58 in 1 : vector<16x128xf32>, vector<16x128xf32> -> vector<16x256xf32>
    %c0_54 = arith.constant 0 : index
    %c129_55 = arith.constant 129 : index
    %60 = vector.load %arg5[%c0_54, %c129_55] : memref<16x640xf32, #tpu.memory_space<vmem>>, vector<16x128xf32>
    %c0_56 = arith.constant 0 : index
    %c385_57 = arith.constant 385 : index
    %61 = vector.load %arg5[%c0_56, %c385_57] : memref<16x640xf32, #tpu.memory_space<vmem>>, vector<16x128xf32>
    %62 = tpu.concatenate %60, %61 in 1 : vector<16x128xf32>, vector<16x128xf32> -> vector<16x256xf32>
    %c0_58 = arith.constant 0 : index
    %c130_59 = arith.constant 130 : index
    %63 = vector.load %arg5[%c0_58, %c130_59] : memref<16x640xf32, #tpu.memory_space<vmem>>, vector<16x128xf32>
    %c0_60 = arith.constant 0 : index
    %c386_61 = arith.constant 386 : index
    %64 = vector.load %arg5[%c0_60, %c386_61] : memref<16x640xf32, #tpu.memory_space<vmem>>, vector<16x128xf32>
    %65 = tpu.concatenate %63, %64 in 1 : vector<16x128xf32>, vector<16x128xf32> -> vector<16x256xf32>
    %c0_62 = arith.constant 0 : index
    %c131_63 = arith.constant 131 : index
    %66 = vector.load %arg5[%c0_62, %c131_63] : memref<16x640xf32, #tpu.memory_space<vmem>>, vector<16x128xf32>
    %c0_64 = arith.constant 0 : index
    %c387_65 = arith.constant 387 : index
    %67 = vector.load %arg5[%c0_64, %c387_65] : memref<16x640xf32, #tpu.memory_space<vmem>>, vector<16x128xf32>
    %68 = tpu.concatenate %66, %67 in 1 : vector<16x128xf32>, vector<16x128xf32> -> vector<16x256xf32>
    %69 = tpu.concatenate %50, %53, %56, %59, %62, %65, %68 in 0 : vector<16x256xf32>, vector<16x256xf32>, vector<16x256xf32>, vector<16x256xf32>, vector<16x256xf32>, vector<16x256xf32>, vector<16x256xf32> -> vector<112x256xf32>
    %70 = arith.truncf %69 : vector<112x256xf32> to vector<112x256xbf16>
    %c32 = arith.constant 32 : index
    %c0_66 = arith.constant 0 : index
    %71 = vector.load %arg2[%c32, %c0_66] : memref<96x128xbf16, #tpu.memory_space<vmem>>, vector<16x112xbf16>
    %cst_67 = arith.constant dense<0.000000e+00> : vector<16x256xf32>
    %72 = tpu.matmul %71, %70, %cst_67 {dimension_numbers = #tpu.dot_dimension_numbers<[1], [0], [0], [1], [0, 0, 1, 1], [], []>} : vector<16x112xbf16>, vector<112x256xbf16>, vector<16x256xf32> -> vector<16x256xf32>
    %c32_68 = arith.constant 32 : index
    %c0_69 = arith.constant 0 : index
    %73 = vector.load %arg3[%c32_68, %c0_69] : memref<88x1xf32, #tpu.memory_space<vmem>>, vector<16x1xf32>
    %74 = vector.broadcast %73 : vector<16x1xf32> to vector<16x256xf32>
    %75 = arith.addf %72, %74 : vector<16x256xf32>
    %cst_70 = arith.constant 0.000000e+00 : f32
    %76 = vector.broadcast %cst_70 : f32 to vector<16x256xf32>
    %77 = arith.maximumf %75, %76 : vector<16x256xf32>
    %78 = arith.addf %77, %40 : vector<16x256xf32>
    %cst_71 = arith.constant 0.000000e+00 : f32
    %79 = vector.broadcast %cst_71 : f32 to vector<16x256xf32>
    %80 = arith.maximumf %78, %79 : vector<16x256xf32>
    %81 = vector.extract_strided_slice %80 {offsets = [0, 0], sizes = [16, 128], strides = [1, 1]} : vector<16x256xf32> to vector<16x128xf32>
    %c0_72 = arith.constant 0 : index
    %c128_73 = arith.constant 128 : index
    %82 = vector.load %arg5[%c0_72, %c128_73] : memref<16x640xf32, #tpu.memory_space<vmem>>, vector<16x128xf32>
    tpu.vector_store %arg5[%c0_72, %c128_73], %81 {strides = array<i32>} : memref<16x640xf32, #tpu.memory_space<vmem>>, vector<16x128xf32>,
    %83 = vector.extract_strided_slice %80 {offsets = [0, 128], sizes = [16, 128], strides = [1, 1]} : vector<16x256xf32> to vector<16x128xf32>
    %c0_74 = arith.constant 0 : index
    %c384_75 = arith.constant 384 : index
    %84 = vector.load %arg5[%c0_74, %c384_75] : memref<16x640xf32, #tpu.memory_space<vmem>>, vector<16x128xf32>
    tpu.vector_store %arg5[%c0_74, %c384_75], %83 {strides = array<i32>} : memref<16x640xf32, #tpu.memory_space<vmem>>, vector<16x128xf32>,
    %c0_76 = arith.constant 0 : index
    %c122 = arith.constant 122 : index
    %85 = vector.load %arg5[%c0_76, %c122] : memref<16x640xf32, #tpu.memory_space<vmem>>, vector<16x128xf32>
    %c0_77 = arith.constant 0 : index
    %c378 = arith.constant 378 : index
    %86 = vector.load %arg5[%c0_77, %c378] : memref<16x640xf32, #tpu.memory_space<vmem>>, vector<16x128xf32>
    %87 = tpu.concatenate %85, %86 in 1 : vector<16x128xf32>, vector<16x128xf32> -> vector<16x256xf32>
    %c0_78 = arith.constant 0 : index
    %c124 = arith.constant 124 : index
    %88 = vector.load %arg5[%c0_78, %c124] : memref<16x640xf32, #tpu.memory_space<vmem>>, vector<16x128xf32>
    %c0_79 = arith.constant 0 : index
    %c380 = arith.constant 380 : index
    %89 = vector.load %arg5[%c0_79, %c380] : memref<16x640xf32, #tpu.memory_space<vmem>>, vector<16x128xf32>
    %90 = tpu.concatenate %88, %89 in 1 : vector<16x128xf32>, vector<16x128xf32> -> vector<16x256xf32>
    %c0_80 = arith.constant 0 : index
    %c126_81 = arith.constant 126 : index
    %91 = vector.load %arg5[%c0_80, %c126_81] : memref<16x640xf32, #tpu.memory_space<vmem>>, vector<16x128xf32>
    %c0_82 = arith.constant 0 : index
    %c382_83 = arith.constant 382 : index
    %92 = vector.load %arg5[%c0_82, %c382_83] : memref<16x640xf32, #tpu.memory_space<vmem>>, vector<16x128xf32>
    %93 = tpu.concatenate %91, %92 in 1 : vector<16x128xf32>, vector<16x128xf32> -> vector<16x256xf32>
    %c0_84 = arith.constant 0 : index
    %c128_85 = arith.constant 128 : index
    %94 = vector.load %arg5[%c0_84, %c128_85] : memref<16x640xf32, #tpu.memory_space<vmem>>, vector<16x128xf32>
    %c0_86 = arith.constant 0 : index
    %c384_87 = arith.constant 384 : index
    %95 = vector.load %arg5[%c0_86, %c384_87] : memref<16x640xf32, #tpu.memory_space<vmem>>, vector<16x128xf32>
    %96 = tpu.concatenate %94, %95 in 1 : vector<16x128xf32>, vector<16x128xf32> -> vector<16x256xf32>
    %c0_88 = arith.constant 0 : index
    %c130_89 = arith.constant 130 : index
    %97 = vector.load %arg5[%c0_88, %c130_89] : memref<16x640xf32, #tpu.memory_space<vmem>>, vector<16x128xf32>
    %c0_90 = arith.constant 0 : index
    %c386_91 = arith.constant 386 : index
    %98 = vector.load %arg5[%c0_90, %c386_91] : memref<16x640xf32, #tpu.memory_space<vmem>>, vector<16x128xf32>
    %99 = tpu.concatenate %97, %98 in 1 : vector<16x128xf32>, vector<16x128xf32> -> vector<16x256xf32>
    %c0_92 = arith.constant 0 : index
    %c132 = arith.constant 132 : index
    %100 = vector.load %arg5[%c0_92, %c132] : memref<16x640xf32, #tpu.memory_space<vmem>>, vector<16x128xf32>
    %c0_93 = arith.constant 0 : index
    %c388 = arith.constant 388 : index
    %101 = vector.load %arg5[%c0_93, %c388] : memref<16x640xf32, #tpu.memory_space<vmem>>, vector<16x128xf32>
    %102 = tpu.concatenate %100, %101 in 1 : vector<16x128xf32>, vector<16x128xf32> -> vector<16x256xf32>
    %c0_94 = arith.constant 0 : index
    %c134 = arith.constant 134 : index
    %103 = vector.load %arg5[%c0_94, %c134] : memref<16x640xf32, #tpu.memory_space<vmem>>, vector<16x128xf32>
    %c0_95 = arith.constant 0 : index
    %c390 = arith.constant 390 : index
    %104 = vector.load %arg5[%c0_95, %c390] : memref<16x640xf32, #tpu.memory_space<vmem>>, vector<16x128xf32>
    %105 = tpu.concatenate %103, %104 in 1 : vector<16x128xf32>, vector<16x128xf32> -> vector<16x256xf32>
    %106 = tpu.concatenate %87, %90, %93, %96, %99, %102, %105 in 0 : vector<16x256xf32>, vector<16x256xf32>, vector<16x256xf32>, vector<16x256xf32>, vector<16x256xf32>, vector<16x256xf32>, vector<16x256xf32> -> vector<112x256xf32>
    %107 = arith.truncf %106 : vector<112x256xf32> to vector<112x256xbf16>
    %c48 = arith.constant 48 : index
    %c0_96 = arith.constant 0 : index
    %108 = vector.load %arg2[%c48, %c0_96] : memref<96x128xbf16, #tpu.memory_space<vmem>>, vector<16x112xbf16>
    %cst_97 = arith.constant dense<0.000000e+00> : vector<16x256xf32>
    %109 = tpu.matmul %108, %107, %cst_97 {dimension_numbers = #tpu.dot_dimension_numbers<[1], [0], [0], [1], [0, 0, 1, 1], [], []>} : vector<16x112xbf16>, vector<112x256xbf16>, vector<16x256xf32> -> vector<16x256xf32>
    %c48_98 = arith.constant 48 : index
    %c0_99 = arith.constant 0 : index
    %110 = vector.load %arg3[%c48_98, %c0_99] : memref<88x1xf32, #tpu.memory_space<vmem>>, vector<16x1xf32>
    %111 = vector.broadcast %110 : vector<16x1xf32> to vector<16x256xf32>
    %112 = arith.addf %109, %111 : vector<16x256xf32>
    %cst_100 = arith.constant 0.000000e+00 : f32
    %113 = vector.broadcast %cst_100 : f32 to vector<16x256xf32>
    %114 = arith.maximumf %112, %113 : vector<16x256xf32>
    %115 = vector.extract_strided_slice %114 {offsets = [0, 0], sizes = [16, 128], strides = [1, 1]} : vector<16x256xf32> to vector<16x128xf32>
    %c0_101 = arith.constant 0 : index
    %c128_102 = arith.constant 128 : index
    %116 = vector.load %arg5[%c0_101, %c128_102] : memref<16x640xf32, #tpu.memory_space<vmem>>, vector<16x128xf32>
    tpu.vector_store %arg5[%c0_101, %c128_102], %115 {strides = array<i32>} : memref<16x640xf32, #tpu.memory_space<vmem>>, vector<16x128xf32>,
    %117 = vector.extract_strided_slice %114 {offsets = [0, 128], sizes = [16, 128], strides = [1, 1]} : vector<16x256xf32> to vector<16x128xf32>
    %c0_103 = arith.constant 0 : index
    %c384_104 = arith.constant 384 : index
    %118 = vector.load %arg5[%c0_103, %c384_104] : memref<16x640xf32, #tpu.memory_space<vmem>>, vector<16x128xf32>
    tpu.vector_store %arg5[%c0_103, %c384_104], %117 {strides = array<i32>} : memref<16x640xf32, #tpu.memory_space<vmem>>, vector<16x128xf32>,
    %c0_105 = arith.constant 0 : index
    %c122_106 = arith.constant 122 : index
    %119 = vector.load %arg5[%c0_105, %c122_106] : memref<16x640xf32, #tpu.memory_space<vmem>>, vector<16x128xf32>
    %c0_107 = arith.constant 0 : index
    %c378_108 = arith.constant 378 : index
    %120 = vector.load %arg5[%c0_107, %c378_108] : memref<16x640xf32, #tpu.memory_space<vmem>>, vector<16x128xf32>
    %121 = tpu.concatenate %119, %120 in 1 : vector<16x128xf32>, vector<16x128xf32> -> vector<16x256xf32>
    %c0_109 = arith.constant 0 : index
    %c124_110 = arith.constant 124 : index
    %122 = vector.load %arg5[%c0_109, %c124_110] : memref<16x640xf32, #tpu.memory_space<vmem>>, vector<16x128xf32>
    %c0_111 = arith.constant 0 : index
    %c380_112 = arith.constant 380 : index
    %123 = vector.load %arg5[%c0_111, %c380_112] : memref<16x640xf32, #tpu.memory_space<vmem>>, vector<16x128xf32>
    %124 = tpu.concatenate %122, %123 in 1 : vector<16x128xf32>, vector<16x128xf32> -> vector<16x256xf32>
    %c0_113 = arith.constant 0 : index
    %c126_114 = arith.constant 126 : index
    %125 = vector.load %arg5[%c0_113, %c126_114] : memref<16x640xf32, #tpu.memory_space<vmem>>, vector<16x128xf32>
    %c0_115 = arith.constant 0 : index
    %c382_116 = arith.constant 382 : index
    %126 = vector.load %arg5[%c0_115, %c382_116] : memref<16x640xf32, #tpu.memory_space<vmem>>, vector<16x128xf32>
    %127 = tpu.concatenate %125, %126 in 1 : vector<16x128xf32>, vector<16x128xf32> -> vector<16x256xf32>
    %c0_117 = arith.constant 0 : index
    %c128_118 = arith.constant 128 : index
    %128 = vector.load %arg5[%c0_117, %c128_118] : memref<16x640xf32, #tpu.memory_space<vmem>>, vector<16x128xf32>
    %c0_119 = arith.constant 0 : index
    %c384_120 = arith.constant 384 : index
    %129 = vector.load %arg5[%c0_119, %c384_120] : memref<16x640xf32, #tpu.memory_space<vmem>>, vector<16x128xf32>
    %130 = tpu.concatenate %128, %129 in 1 : vector<16x128xf32>, vector<16x128xf32> -> vector<16x256xf32>
    %c0_121 = arith.constant 0 : index
    %c130_122 = arith.constant 130 : index
    %131 = vector.load %arg5[%c0_121, %c130_122] : memref<16x640xf32, #tpu.memory_space<vmem>>, vector<16x128xf32>
    %c0_123 = arith.constant 0 : index
    %c386_124 = arith.constant 386 : index
    %132 = vector.load %arg5[%c0_123, %c386_124] : memref<16x640xf32, #tpu.memory_space<vmem>>, vector<16x128xf32>
    %133 = tpu.concatenate %131, %132 in 1 : vector<16x128xf32>, vector<16x128xf32> -> vector<16x256xf32>
    %c0_125 = arith.constant 0 : index
    %c132_126 = arith.constant 132 : index
    %134 = vector.load %arg5[%c0_125, %c132_126] : memref<16x640xf32, #tpu.memory_space<vmem>>, vector<16x128xf32>
    %c0_127 = arith.constant 0 : index
    %c388_128 = arith.constant 388 : index
    %135 = vector.load %arg5[%c0_127, %c388_128] : memref<16x640xf32, #tpu.memory_space<vmem>>, vector<16x128xf32>
    %136 = tpu.concatenate %134, %135 in 1 : vector<16x128xf32>, vector<16x128xf32> -> vector<16x256xf32>
    %c0_129 = arith.constant 0 : index
    %c134_130 = arith.constant 134 : index
    %137 = vector.load %arg5[%c0_129, %c134_130] : memref<16x640xf32, #tpu.memory_space<vmem>>, vector<16x128xf32>
    %c0_131 = arith.constant 0 : index
    %c390_132 = arith.constant 390 : index
    %138 = vector.load %arg5[%c0_131, %c390_132] : memref<16x640xf32, #tpu.memory_space<vmem>>, vector<16x128xf32>
    %139 = tpu.concatenate %137, %138 in 1 : vector<16x128xf32>, vector<16x128xf32> -> vector<16x256xf32>
    %140 = tpu.concatenate %121, %124, %127, %130, %133, %136, %139 in 0 : vector<16x256xf32>, vector<16x256xf32>, vector<16x256xf32>, vector<16x256xf32>, vector<16x256xf32>, vector<16x256xf32>, vector<16x256xf32> -> vector<112x256xf32>
    %141 = arith.truncf %140 : vector<112x256xf32> to vector<112x256xbf16>
    %c64 = arith.constant 64 : index
    %c0_133 = arith.constant 0 : index
    %142 = vector.load %arg2[%c64, %c0_133] : memref<96x128xbf16, #tpu.memory_space<vmem>>, vector<16x112xbf16>
    %cst_134 = arith.constant dense<0.000000e+00> : vector<16x256xf32>
    %143 = tpu.matmul %142, %141, %cst_134 {dimension_numbers = #tpu.dot_dimension_numbers<[1], [0], [0], [1], [0, 0, 1, 1], [], []>} : vector<16x112xbf16>, vector<112x256xbf16>, vector<16x256xf32> -> vector<16x256xf32>
    %c64_135 = arith.constant 64 : index
    %c0_136 = arith.constant 0 : index
    %144 = vector.load %arg3[%c64_135, %c0_136] : memref<88x1xf32, #tpu.memory_space<vmem>>, vector<16x1xf32>
    %145 = vector.broadcast %144 : vector<16x1xf32> to vector<16x256xf32>
    %146 = arith.addf %143, %145 : vector<16x256xf32>
    %cst_137 = arith.constant 0.000000e+00 : f32
    %147 = vector.broadcast %cst_137 : f32 to vector<16x256xf32>
    %148 = arith.maximumf %146, %147 : vector<16x256xf32>
    %149 = arith.addf %148, %80 : vector<16x256xf32>
    %cst_138 = arith.constant 0.000000e+00 : f32
    %150 = vector.broadcast %cst_138 : f32 to vector<16x256xf32>
    %151 = arith.maximumf %149, %150 : vector<16x256xf32>
    %c80 = arith.constant 80 : index
    %c0_139 = arith.constant 0 : index
    %152 = vector.load %arg2[%c80, %c0_139] : memref<96x128xbf16, #tpu.memory_space<vmem>>, vector<8x16xbf16>
    %153 = arith.truncf %151 : vector<16x256xf32> to vector<16x256xbf16>
    %cst_140 = arith.constant dense<0.000000e+00> : vector<8x256xf32>
    %154 = tpu.matmul %152, %153, %cst_140 {dimension_numbers = #tpu.dot_dimension_numbers<[1], [0], [0], [1], [0, 0, 1, 1], [], []>} : vector<8x16xbf16>, vector<16x256xbf16>, vector<8x256xf32> -> vector<8x256xf32>
    %c80_141 = arith.constant 80 : index
    %c0_142 = arith.constant 0 : index
    %155 = vector.load %arg3[%c80_141, %c0_142] : memref<88x1xf32, #tpu.memory_space<vmem>>, vector<8x1xf32>
    %156 = vector.broadcast %155 : vector<8x1xf32> to vector<8x256xf32>
    %157 = arith.addf %154, %156 : vector<8x256xf32>
    %158 = vector.extract_strided_slice %157 {offsets = [0, 0], sizes = [8, 128], strides = [1, 1]} : vector<8x256xf32> to vector<8x128xf32>
    %c0_143 = arith.constant 0 : index
    %c0_144 = arith.constant 0 : index
    %c0_145 = arith.constant 0 : index
    %159 = vector.load %arg4[%c0_143, %c0_144, %c0_145] : memref<2x8x128xf32, #tpu.memory_space<vmem>>, vector<1x8x128xf32>
    %160 = vector.shape_cast %159 : vector<1x8x128xf32> to vector<8x128xf32>
    %161 = vector.shape_cast %158 : vector<8x128xf32> to vector<1x8x128xf32>
    tpu.vector_store %arg4[%c0_143, %c0_144, %c0_145], %161 {strides = array<i32>} : memref<2x8x128xf32, #tpu.memory_space<vmem>>, vector<1x8x128xf32>,
    %162 = vector.extract_strided_slice %157 {offsets = [0, 128], sizes = [8, 128], strides = [1, 1]} : vector<8x256xf32> to vector<8x128xf32>
    %c1_146 = arith.constant 1 : index
    %c0_147 = arith.constant 0 : index
    %c0_148 = arith.constant 0 : index
    %163 = vector.load %arg4[%c1_146, %c0_147, %c0_148] : memref<2x8x128xf32, #tpu.memory_space<vmem>>, vector<1x8x128xf32>
    %164 = vector.shape_cast %163 : vector<1x8x128xf32> to vector<8x128xf32>
    %165 = vector.shape_cast %162 : vector<8x128xf32> to vector<1x8x128xf32>
    tpu.vector_store %arg4[%c1_146, %c0_147, %c0_148], %165 {strides = array<i32>} : memref<2x8x128xf32, #tpu.memory_space<vmem>>, vector<1x8x128xf32>,
    return
  }
  func.func @transform_0(%arg0: i32) -> (i32, i32, i32) {
    %c0_i32 = arith.constant 0 : i32
    %c0_i32_0 = arith.constant 0 : i32
    %c0_i32_1 = arith.constant 0 : i32
    return %arg0, %c0_i32, %c0_i32_0 : i32, i32, i32
  }
  func.func @transform_1(%arg0: i32) -> (i32, i32) {
    %c0_i32 = arith.constant 0 : i32
    %c0_i32_0 = arith.constant 0 : i32
    %c0_i32_1 = arith.constant 0 : i32
    return %c0_i32, %c0_i32_0 : i32, i32
  }
  func.func @transform_2(%arg0: i32) -> (i32, i32) {
    %c0_i32 = arith.constant 0 : i32
    %c0_i32_0 = arith.constant 0 : i32
    %c0_i32_1 = arith.constant 0 : i32
    return %c0_i32, %c0_i32_0 : i32, i32
  }
  func.func @transform_3(%arg0: i32) -> (i32, i32, i32) {
    %c0_i32 = arith.constant 0 : i32
    %c0_i32_0 = arith.constant 0 : i32
    %c0_i32_1 = arith.constant 0 : i32
    return %arg0, %c0_i32, %c0_i32_0 : i32, i32, i32
  }
}

</mosaic_0001>

<bundles_post_ra>
// kernel: tcn_forward.1
= control target key start
LH: loop header
LB: loop body
LE: loop exit
PB: predicated region body
PF: predicated region fallthrough
CT: control target
= control target key end

     0   :  { %v1531_v2 = vmov 0.0   ;;  %s1532_s16 = smov 3   ;;  %s1533_s17 = smov 2   ;;  %v1537_v7 = vmov 0   ;;  %vm36_vm0 = vcmask 23552   ;;  %vm51_vm1 = vcmask 15360   ;;  %s1955_s0 = inlined_call_operand.vmem [shape: f32[2,8,128], index: 0, kind: input, shape index: {}]   ;;  %s1956_s1 = inlined_call_operand.vmem [shape: bf16[96,128], index: 1, kind: input, shape index: {}]   ;;  %s1957_s2 = inlined_call_operand.vmem [shape: f32[88,1], index: 2, kind: input, shape index: {}]   ;;  %s1958_s3 = inlined_call_operand.vmem [shape: f32[2,8,128], index: 3, kind: output, shape index: {}]  }
   0x1   :  { %v1566_v0 = vld [vmem:[%s1955_s0 + $0x8] sm:$0xff]  ;;  %v1571_v1 = vld [vmem:[%s1955_s0] sm:$0xff]  ;;  %s1534_s18 = smov 1   ;;  %s1535_s0 = smov 127   ;;  %206 = vmatprep.mubr.bf16.mxu0 %v1537_v7  ;;  %1164 = vset.pattern.permute.xlu0 %v1537_v7  ;;  %vm64_vm2 = vcmask 7168   ;;  %vm78_vm3 = vcmask 1039360  }
   0x2   :  { %v1104_v3 = vpack.i.bf16 %v1566_v0, %v1531_v2  ;;  %v1114_v4 = vpack.i.bf16 %v1571_v1, %v1531_v2  ;;  %v1134_v5 = vpack.i.bf16 %v1531_v2, %v1566_v0  ;;  %s1536_s19 = smov 126   ;;  %v1144_v6 = vpack.i.bf16 %v1531_v2, %v1571_v1  ;;  %1165 = vset.pattern.permute.xlu1 %v1537_v7  ;;  %s1538_s20 = smov 125   ;;  %v126_v8 = vld [vmem:[%s1957_s2] sm:$0xff]  ;;  %v127_v9 = vld [vmem:[%s1957_s2 + $0x8] sm:$0xff] }
   0x3   :  { %472 = vmatprep.mubr.bf16.mxu1 %v1537_v7  ;;  %vm92_vm4 = vcmask 1031168   ;;  %vm105_vm5 = vcmask 1022976   ;;  %vm167_vm6 = vcmask 1043456   ;;  %vm160_vm7 = vcmask 457728   ;;  %s1539_s12 = smov 6   ;;  %s1540_s13 = smov 4  }
   0x4   :  { %1105 = vrot.lane.b32.xlu0 %v1104_v3, %s1532_s16  ;;  %1115 = vrot.lane.b32.xlu1 %v1114_v4, %s1532_s16  ;;  %vm436_vm8 = vcmask 916480   ;;  %s1541_s14 = smov 124   ;;  %s1542_s15 = smov 122   ;;  %vm519_vm9 = vcmask 48128   ;;  %vm548_vm10 = vcmask 31744   ;;  %vm629_vm11 = vcmask 1014784  }
   0x5   :  { %vm654_vm12 = vcmask 998400   ;;  %vm1026_vm13 = vcmask 130048  }
   0x8   :  { %1110 = vrot.lane.b32.xlu0 %v1104_v3, %s1533_s17  ;;  %1120 = vrot.lane.b32.xlu1 %v1114_v4, %s1533_s17 }
   0xc   :  { %1125 = vrot.lane.b32.xlu0 %v1104_v3, %s1534_s18  ;;  %1130 = vrot.lane.b32.xlu1 %v1114_v4, %s1534_s18  ;;  %v1526_v4 = vld [vmem:[%s1956_s1] sm:$0xff]  }
  0x10   :  { %1135 = vrot.lane.b32.xlu0 %v1134_v5, %s1535_s0  ;;  %1140 = vrot.lane.b32.xlu1 %v1134_v5, %s1536_s19 }
  0x14   :  { %1145 = vrot.lane.b32.xlu0 %v1144_v6, %s1535_s0  ;;  %1150 = vrot.lane.b32.xlu1 %v1144_v6, %s1536_s19 }
  0x18   :  { %1155 = vrot.lane.b32.xlu0 %v1144_v6, %s1538_s20  ;;  %1160 = vrot.lane.b32.xlu1 %v1134_v5, %s1538_s20  ;;  %v1527_v5 = vld [vmem:[%s1956_s1 + $0x8] sm:$0xff]  }
  0x1c   :  { %132 = vperm.xlu0 %1164, %v126_v8   ;;  %137 = vperm.xlu1 %1165, %v127_v9  }
  0x76   :  { %v1106_v10 = vpop.permute.xlu0 %1105  ;;  %v1116_v11 = vpop.permute.xlu1 %1115 }
  0x77   :  { %v1108_v12 = vunpack.i.h.bf16 %v1106_v10  ;;  %v1107_v13 = vunpack.i.l.bf16 %v1106_v10  ;;  %v1118_v14 = vunpack.i.h.bf16 %v1116_v11  ;;  %v1117_v15 = vunpack.i.l.bf16 %v1116_v11 }
  0x79   :  { %v45_v22 = vsel %vm36_vm0, %v1107_v13, %v1108_v12  ;;  %v37_v24 = vsel %vm36_vm0, %v1117_v15, %v1118_v14 }
  0x7a   :  { %v1111_v16 = vpop.permute.xlu0 %1110  ;;  %v1121_v17 = vpop.permute.xlu1 %1120 }
  0x7b   :  { %v1113_v18 = vunpack.i.h.bf16 %v1111_v16  ;;  %v1112_v19 = vunpack.i.l.bf16 %v1111_v16  ;;  %v1123_v20 = vunpack.i.h.bf16 %v1121_v17  ;;  %v1122_v21 = vunpack.i.l.bf16 %v1121_v17 }
  0x7d   :  { %v58_v23 = vsel %vm51_vm1, %v1112_v19, %v1113_v18  ;;  %v52_v25 = vsel %vm51_vm1, %v1122_v21, %v1123_v20 }
  0x7e   :  { %v1126_v26 = vpop.permute.xlu0 %1125  ;;  %v1131_v27 = vpop.permute.xlu1 %1130  ;;  %v115_v28 = vpack.c.bf16 %v58_v23, %v45_v22  ;;  %v114_v29 = vpack.c.bf16 %v52_v25, %v37_v24 }
  0x7f   :  { %v1128_v30 = vunpack.i.h.bf16 %v1126_v26  ;;  %v1127_v31 = vunpack.i.l.bf16 %v1126_v26  ;;  %v1133_v32 = vunpack.i.h.bf16 %v1131_v27  ;;  %v1132_v33 = vunpack.i.l.bf16 %v1131_v27 }
  0x80   :  { %174 = vmatprep.subr.bf16.mxu0 %v115_v28 }
  0x81   :  { %175 = vmatpush1.bf16.msra.mxu0 %v114_v29  ;;  %v71_v34 = vsel %vm64_vm2, %v1127_v31, %v1128_v30  ;;  %v65_v35 = vsel %vm64_vm2, %v1132_v33, %v1133_v32  ;;  %v419_v31 = vld [vmem:[%s1957_s2 + $0x20] sm:$0xff]  ;;  %v420_v32 = vld [vmem:[%s1957_s2 + $0x28] sm:$0xff]  ;;  %v128_v33 = vld [vmem:[%s1957_s2 + $0x10] sm:$0xff] }
  0x82   :  { %v1136_v36 = vpop.permute.xlu0 %1135  ;;  %v1141_v37 = vpop.permute.xlu1 %1140  ;;  %v117_v38 = vpack.c.bf16 %v1566_v0, %v71_v34  ;;  %v116_v39 = vpack.c.bf16 %v1571_v1, %v65_v35 }
  0x83   :  { %v1138_v40 = vunpack.i.h.bf16 %v1136_v36  ;;  %v1137_v41 = vunpack.i.l.bf16 %v1136_v36  ;;  %v1143_v42 = vunpack.i.h.bf16 %v1141_v37  ;;  %v1142_v43 = vunpack.i.l.bf16 %v1141_v37  ;;  %v129_v36 = vld [vmem:[%s1957_s2 + $0x18] sm:$0xff] }
  0x84   :  { %176 = vmatprep.subr.bf16.mxu0 %v117_v38 }
  0x85   :  { %177 = vmatpush1.bf16.msra.mxu0 %v116_v39  ;;  %v86_v44 = vsel %vm78_vm3, %v1137_v41, %v1138_v40  ;;  %v99_v45 = vsel %vm92_vm4, %v1142_v43, %v1143_v42 }
  0x86   :  { %v1146_v46 = vpop.permute.xlu0 %1145  ;;  %v1151_v47 = vpop.permute.xlu1 %1150  ;;  %v119_v48 = vpack.c.bf16 %v99_v45, %v86_v44 }
  0x87   :  { %v1148_v49 = vunpack.i.h.bf16 %v1146_v46  ;;  %v1147_v50 = vunpack.i.l.bf16 %v1146_v46  ;;  %v1153_v51 = vunpack.i.h.bf16 %v1151_v47  ;;  %v1152_v52 = vunpack.i.l.bf16 %v1151_v47 }
  0x88   :  { %178 = vmatprep.subr.bf16.mxu0 %v119_v48 }
  0x89   :  { %v79_v53 = vsel %vm78_vm3, %v1147_v50, %v1148_v49  ;;  %v93_v54 = vsel %vm92_vm4, %v1152_v52, %v1153_v51 }
  0x8a   :  { %v1156_v55 = vpop.permute.xlu0 %1155  ;;  %v1161_v56 = vpop.permute.xlu1 %1160  ;;  %v118_v57 = vpack.c.bf16 %v93_v54, %v79_v53 }
  0x8b   :  { %v1158_v58 = vunpack.i.h.bf16 %v1156_v55  ;;  %v1157_v59 = vunpack.i.l.bf16 %v1156_v55  ;;  %v1163_v60 = vunpack.i.h.bf16 %v1161_v56  ;;  %v1162_v61 = vunpack.i.l.bf16 %v1161_v56 }
  0x8c   :  { %179 = vmatpush1.bf16.msra.mxu0 %v118_v57 }
  0x8d   :  { %v112_v62 = vsel %vm105_vm5, %v1162_v61, %v1163_v60  ;;  %v106_v63 = vsel %vm105_vm5, %v1157_v59, %v1158_v58 }
  0x8e   :  { %v121_v0 = vpack.c.bf16 %v112_v62, %v112_v62  ;;  %v120_v1 = vpack.c.bf16 %v106_v63, %v106_v63 }
  0x90   :  { %1081 = vmatprep.subr.msk.bf16.mxu0 %vm167_vm6, %v121_v0  ;;  %v169_v3 = vsel %vm167_vm6, %v120_v1, 0 }
  0x91   :  { %181 = vmatpush1.bf16.msra.mxu0 %v169_v3 }
  0x94   :  { %1082 = vmatmul.mubr.msk.bf16.vlgmr.msra.gmra.mrb[0].mxu0 %vm160_vm7, %v1526_v4 }
  0x95   :  { %216 = vmatprep.mubr.bf16.mxu0 %v1537_v7 }
  0x9b   :  { %v133_v6 = vpop.permute.xlu0 %132  ;;  %v138_v9 = vpop.permute.xlu1 %137 }
  0x9c   :  { %1083 = vmatmul.mubr.msk.bf16.gmra.mrb[4].mxu0 %vm160_vm7, %v1527_v5 }
  0x9d   :  { %739 = vmatprep.mubr.bf16.mxu0 %v1537_v7 }
 0x167   :  { %v208_v8 = vpop.f32.mrb[0].mxu0 }
 0x168   :  { %v209_v10 = vadd.f32 %v208_v8, %v133_v6  ;;  %v210_v11 = vpop.f32.mrb[1].mxu0 }
 0x169   :  { %v212_v12 = vpop.f32.mrb[2].mxu0  ;;  %v211_v17 = vadd.f32 %v210_v11, %v133_v6 }
 0x16a   :  { %v1625_v13 = vmax.f32 %v209_v10, 0.0  ;;  %v213_v14 = vadd.f32 %v212_v12, %v138_v9  ;;  %v214_v15 = vpop.f32.mrb[3].mxu0 }
 0x16b   :  { %v215_v16 = vadd.f32 %v214_v15, %v138_v9  ;;  %v1636_v22 = vmax.f32 %v211_v17, 0.0 }
 0x16c   :  { %v1627_v18 = vmax.f32 %v213_v14, 0.0  ;;  %v1166_v19 = vpack.i.bf16 %v1625_v13, %v1531_v2  ;;  %v1181_v25 = vpack.i.bf16 %v1531_v2, %v1625_v13 }
 0x16d   :  { %v1631_v20 = vmax.f32 %v215_v16, 0.0  ;;  %v1186_v27 = vpack.i.bf16 %v1636_v22, %v1531_v2  ;;  %v1206_v29 = vpack.i.bf16 %v1531_v2, %v1636_v22 }
 0x16e   :  { %1167 = vrot.lane.b32.xlu1 %v1166_v19, %s1532_s16  ;;  %v1216_v21 = vpack.i.bf16 %v1627_v18, %v1531_v2  ;;  %v409_v24 = vpack.c.bf16 %v1627_v18, %v1625_v13  ;;  %v1231_v26 = vpack.i.bf16 %v1531_v2, %v1627_v18 }
 0x16f   :  { %v410_v23 = vpack.c.bf16 %v1631_v20, %v1636_v22  ;;  %v1236_v28 = vpack.i.bf16 %v1631_v20, %v1531_v2  ;;  %v1266_v30 = vpack.i.bf16 %v1531_v2, %v1631_v20  ;;  %v1686_v34 = vpop.f32.mrb[4].mxu0 }
 0x170   :  { %1217 = vrot.lane.b32.xlu0 %v1216_v21, %s1532_s16  ;;  %v1688_v35 = vpop.f32.mrb[5].mxu0 }
 0x171   :  { %v1693_v37 = vpop.f32.mrb[6].mxu0 }
 0x172   :  { %1172 = vrot.lane.b32.xlu1 %v1166_v19, %s1533_s17  ;;  %v1695_v38 = vpop.f32.mrb[7].mxu0 }
 0x174   :  { %1222 = vrot.lane.b32.xlu0 %v1216_v21, %s1533_s17 }
 0x176   :  { %1177 = vrot.lane.b32.xlu1 %v1166_v19, %s1534_s18 }
 0x178   :  { %1227 = vrot.lane.b32.xlu0 %v1216_v21, %s1534_s18 }
 0x17a   :  { %1182 = vrot.lane.b32.xlu1 %v1181_v25, %s1535_s0 }
 0x17c   :  { %1232 = vrot.lane.b32.xlu0 %v1231_v26, %s1535_s0 }
 0x17e   :  { %1187 = vrot.lane.b32.xlu1 %v1186_v27, %s1532_s16 }
 0x180   :  { %1237 = vrot.lane.b32.xlu0 %v1236_v28, %s1532_s16 }
 0x182   :  { %1192 = vrot.lane.b32.xlu1 %v1186_v27, %s1533_s17 }
 0x184   :  { %1242 = vrot.lane.b32.xlu0 %v1236_v28, %s1533_s17 }
 0x186   :  { %1197 = vrot.lane.b32.xlu1 %v1186_v27, %s1534_s18 }
 0x188   :  { %1247 = vrot.lane.b32.xlu0 %v1236_v28, %s1534_s18 }
 0x18a   :  { %1202 = vrot.lane.b32.xlu1 %v1181_v25, %s1536_s19 }
 0x18c   :  { %1252 = vrot.lane.b32.xlu0 %v1231_v26, %s1536_s19 }
 0x18e   :  { %1207 = vrot.lane.b32.xlu1 %v1206_v29, %s1535_s0 }
 0x190   :  { %1267 = vrot.lane.b32.xlu0 %v1266_v30, %s1535_s0 }
 0x192   :  { %1212 = vrot.lane.b32.xlu1 %v1206_v29, %s1536_s19 }
 0x194   :  { %1272 = vrot.lane.b32.xlu0 %v1266_v30, %s1536_s19 }
 0x196   :  { %1257 = vrot.lane.b32.xlu1 %v1206_v29, %s1538_s20 }
 0x198   :  { %1277 = vrot.lane.b32.xlu0 %v1266_v30, %s1538_s20 }
 0x19a   :  { %1262 = vrot.lane.b32.xlu1 %v1181_v25, %s1538_s20 }
 0x19c   :  { %1282 = vrot.lane.b32.xlu0 %v1231_v26, %s1538_s20 }
 0x19e   :  { %423 = vperm.xlu1 %1165, %v419_v31  }
 0x1a0   :  { %428 = vperm.xlu0 %1164, %v420_v32  }
 0x1a2   :  { %142 = vperm.xlu1 %1165, %v128_v33  }
 0x1a4   :  { %147 = vperm.xlu0 %1164, %v129_v36  }
 0x1e0   :  { %v1168_v39 = vpop.permute.xlu1 %1167 }
 0x1e1   :  { %v1170_v52 = vunpack.i.h.bf16 %v1168_v39  ;;  %v1169_v53 = vunpack.i.l.bf16 %v1168_v39 }
 0x1e2   :  { %v1218_v40 = vpop.permute.xlu0 %1217 }
 0x1e3   :  { %v1220_v47 = vunpack.i.h.bf16 %v1218_v40  ;;  %v1219_v48 = vunpack.i.l.bf16 %v1218_v40  ;;  %v255_v6 = vsel %vm36_vm0, %v1169_v53, %v1170_v52 }
 0x1e4   :  { %v1173_v41 = vpop.permute.xlu1 %1172 }
 0x1e5   :  { %v256_v60 = vsel %vm36_vm0, %v1219_v48, %v1220_v47  ;;  %v1175_v1 = vunpack.i.h.bf16 %v1173_v41  ;;  %v1174_v3 = vunpack.i.l.bf16 %v1173_v41 }
 0x1e6   :  { %v1223_v42 = vpop.permute.xlu0 %1222  ;;  %v403_v10 = vpack.c.bf16 %v256_v60, %v255_v6 }
 0x1e7   :  { %v1225_v57 = vunpack.i.h.bf16 %v1223_v42  ;;  %v1224_v58 = vunpack.i.l.bf16 %v1223_v42  ;;  %v283_v29 = vsel %vm51_vm1, %v1174_v3, %v1175_v1 }
 0x1e8   :  { %v1178_v43 = vpop.permute.xlu1 %1177 }
 0x1e9   :  { %v284_v15 = vsel %vm51_vm1, %v1224_v58, %v1225_v57  ;;  %v1180_v25 = vunpack.i.h.bf16 %v1178_v43  ;;  %v1179_v26 = vunpack.i.l.bf16 %v1178_v43 }
 0x1ea   :  { %v1228_v44 = vpop.permute.xlu0 %1227  ;;  %v405_v32 = vpack.c.bf16 %v284_v15, %v283_v29 }
 0x1eb   :  { %v1230_v11 = vunpack.i.h.bf16 %v1228_v44  ;;  %v1229_v12 = vunpack.i.l.bf16 %v1228_v44  ;;  %v307_v43 = vsel %vm64_vm2, %v1179_v26, %v1180_v25 }
 0x1ec   :  { %v1697_v45 = vpop.permute.xlu1 %1182 }
 0x1ed   :  { %v308_v36 = vsel %vm64_vm2, %v1229_v12, %v1230_v11  ;;  %v1185_v52 = vunpack.i.h.bf16 %v1697_v45  ;;  %v1184_v53 = vunpack.i.l.bf16 %v1697_v45 }
 0x1ee   :  { %v1699_v46 = vpop.permute.xlu0 %1232  ;;  %v407_v44 = vpack.c.bf16 %v308_v36, %v307_v43 }
 0x1ef   :  { %v1235_v47 = vunpack.i.h.bf16 %v1699_v46  ;;  %v1234_v48 = vunpack.i.l.bf16 %v1699_v46 }
 0x1f0   :  { %v1188_v49 = vpop.permute.xlu1 %1187 }
 0x1f1   :  { %v1190_v50 = vunpack.i.h.bf16 %v1188_v49  ;;  %v1189_v51 = vunpack.i.l.bf16 %v1188_v49  ;;  %v336_v46 = vsel %vm78_vm3, %v1234_v48, %v1235_v47 }
 0x1f2   :  { %v1238_v54 = vpop.permute.xlu0 %1237 }
 0x1f3   :  { %v1240_v55 = vunpack.i.h.bf16 %v1238_v54  ;;  %v1239_v56 = vunpack.i.l.bf16 %v1238_v54  ;;  %v271_v63 = vsel %vm36_vm0, %v1189_v51, %v1190_v50 }
 0x1f4   :  { %v1193_v59 = vpop.permute.xlu1 %1192 }
 0x1f5   :  { %v1195_v61 = vunpack.i.h.bf16 %v1193_v59  ;;  %v1194_v62 = vunpack.i.l.bf16 %v1193_v59  ;;  %v272_v0 = vsel %vm36_vm0, %v1239_v56, %v1240_v55 }
 0x1f6   :  { %v1243_v4 = vpop.permute.xlu0 %1242  ;;  %v404_v5 = vpack.c.bf16 %v272_v0, %v271_v63  ;;  %v335_v0 = vsel %vm78_vm3, %v1184_v53, %v1185_v52 }
 0x1f7   :  { %v1245_v8 = vunpack.i.h.bf16 %v1243_v4  ;;  %v1244_v9 = vunpack.i.l.bf16 %v1243_v4  ;;  %v295_v19 = vsel %vm51_vm1, %v1194_v62, %v1195_v61  ;;  %v411_v4 = vpack.c.bf16 %v336_v46, %v335_v0 }
 0x1f8   :  { %v1198_v14 = vpop.permute.xlu1 %1197  ;;  %440 = vmatprep.subr.bf16.mxu1 %v404_v5 }
 0x1f9   :  { %v1200_v16 = vunpack.i.h.bf16 %v1198_v14  ;;  %v1199_v17 = vunpack.i.l.bf16 %v1198_v14  ;;  %441 = vmatpush1.bf16.msra.mxu1 %v403_v10  ;;  %v296_v21 = vsel %vm51_vm1, %v1244_v9, %v1245_v8 }
 0x1fa   :  { %v1248_v27 = vpop.permute.xlu0 %1247  ;;  %v406_v28 = vpack.c.bf16 %v296_v21, %v295_v19 }
 0x1fb   :  { %v1250_v30 = vunpack.i.h.bf16 %v1248_v27  ;;  %v1249_v31 = vunpack.i.l.bf16 %v1248_v27  ;;  %v319_v39 = vsel %vm64_vm2, %v1199_v17, %v1200_v16 }
 0x1fc   :  { %v1203_v33 = vpop.permute.xlu1 %1202  ;;  %442 = vmatprep.subr.bf16.mxu1 %v406_v28 }
 0x1fd   :  { %443 = vmatpush1.bf16.msra.mxu1 %v405_v32  ;;  %v320_v40 = vsel %vm64_vm2, %v1249_v31, %v1250_v30  ;;  %v1205_v63 = vunpack.i.h.bf16 %v1203_v33  ;;  %v1204_v20 = vunpack.i.l.bf16 %v1203_v33  ;;  %v1528_v33 = vld [vmem:[%s1956_s1 + $0x10] sm:$0xff]  }
 0x1fe   :  { %v1253_v41 = vpop.permute.xlu0 %1252  ;;  %v408_v42 = vpack.c.bf16 %v320_v40, %v319_v39 }
 0x1ff   :  { %v1255_v57 = vunpack.i.h.bf16 %v1253_v41  ;;  %v1254_v58 = vunpack.i.l.bf16 %v1253_v41  ;;  %v363_v11 = vsel %vm92_vm4, %v1204_v20, %v1205_v63 }
 0x200   :  { %v1208_v49 = vpop.permute.xlu1 %1207  ;;  %444 = vmatprep.subr.bf16.mxu1 %v408_v42 }
 0x201   :  { %v1210_v50 = vunpack.i.h.bf16 %v1208_v49  ;;  %v1209_v51 = vunpack.i.l.bf16 %v1208_v49  ;;  %445 = vmatpush1.bf16.msra.mxu1 %v407_v44  ;;  %v364_v6 = vsel %vm92_vm4, %v1254_v58, %v1255_v57 }
 0x202   :  { %v1268_v54 = vpop.permute.xlu0 %1267  ;;  %446 = vmatprep.subr.bf16.mxu1 %v410_v23  ;;  %v413_v15 = vpack.c.bf16 %v364_v6, %v363_v11 }
 0x203   :  { %v1270_v55 = vunpack.i.h.bf16 %v1268_v54  ;;  %v1269_v56 = vunpack.i.l.bf16 %v1268_v54  ;;  %v351_v45 = vsel %vm78_vm3, %v1209_v51, %v1210_v50 }
 0x204   :  { %v1213_v59 = vpop.permute.xlu1 %1212 }
 0x205   :  { %v1215_v60 = vunpack.i.h.bf16 %v1213_v59  ;;  %v1214_v61 = vunpack.i.l.bf16 %v1213_v59  ;;  %447 = vmatpush1.bf16.msra.mxu1 %v409_v24  ;;  %v352_v62 = vsel %vm78_vm3, %v1269_v56, %v1270_v55 }
 0x206   :  { %v1273_v22 = vpop.permute.xlu0 %1272  ;;  %v412_v23 = vpack.c.bf16 %v352_v62, %v351_v45 }
 0x207   :  { %v1275_v1 = vunpack.i.h.bf16 %v1273_v22  ;;  %v1274_v3 = vunpack.i.l.bf16 %v1273_v22  ;;  %v375_v18 = vsel %vm92_vm4, %v1214_v61, %v1215_v60 }
 0x208   :  { %v1258_v5 = vpop.permute.xlu1 %1257  ;;  %448 = vmatprep.subr.bf16.mxu1 %v412_v23 }
 0x209   :  { %v1260_v8 = vunpack.i.h.bf16 %v1258_v5  ;;  %v1259_v13 = vunpack.i.l.bf16 %v1258_v5  ;;  %449 = vmatpush1.bf16.msra.mxu1 %v411_v4  ;;  %v376_v24 = vsel %vm92_vm4, %v1274_v3, %v1275_v1  ;;  %v687_v4 = vld [vmem:[%s1957_s2 + $0x30] sm:$0xff]  ;;  %v688_v5 = vld [vmem:[%s1957_s2 + $0x38] sm:$0xff] }
 0x20a   :  { %v1278_v9 = vpop.permute.xlu0 %1277  ;;  %v414_v10 = vpack.c.bf16 %v376_v24, %v375_v18 }
 0x20b   :  { %v1280_v12 = vunpack.i.h.bf16 %v1278_v9  ;;  %v1279_v14 = vunpack.i.l.bf16 %v1278_v9  ;;  %v399_v21 = vsel %vm105_vm5, %v1259_v13, %v1260_v8 }
 0x20c   :  { %v1263_v16 = vpop.permute.xlu1 %1262  ;;  %450 = vmatprep.subr.bf16.mxu1 %v414_v10 }
 0x20d   :  { %v1265_v17 = vunpack.i.h.bf16 %v1263_v16  ;;  %v1264_v19 = vunpack.i.l.bf16 %v1263_v16  ;;  %451 = vmatpush1.bf16.msra.mxu1 %v413_v15  ;;  %v400_v25 = vsel %vm105_vm5, %v1279_v14, %v1280_v12 }
 0x20e   :  { %v1283_v26 = vpop.permute.xlu0 %1282  ;;  %v416_v27 = vpack.c.bf16 %v400_v25, %v399_v21 }
 0x20f   :  { %v1285_v28 = vunpack.i.h.bf16 %v1283_v26  ;;  %v1284_v29 = vunpack.i.l.bf16 %v1283_v26  ;;  %v387_v30 = vsel %vm105_vm5, %v1264_v19, %v1265_v17 }
 0x210   :  { %452 = vmatprep.subr.bf16.mxu1 %v416_v27 }
 0x211   :  { %v388_v31 = vsel %vm105_vm5, %v1284_v29, %v1285_v28 }
 0x212   :  { %v415_v32 = vpack.c.bf16 %v388_v31, %v387_v30 }
 0x214   :  { %453 = vmatpush1.bf16.msra.mxu1 %v415_v32 }
 0x217   :  { %1085 = vmatmul.mubr.msk.bf16.vlgmr.msra.gmra.mrb[0].mxu1 %vm436_vm8, %v1528_v33 }
 0x218   :  { %994 = vmatprep.mubr.bf16.mxu1 %v1537_v7 }
 0x21d   :  { %v424_v36 = vpop.permute.xlu1 %423 }
 0x21f   :  { %v429_v39 = vpop.permute.xlu0 %428 }
 0x221   :  { %v143_v40 = vpop.permute.xlu1 %142 }
 0x222   :  { %v219_v49 = vadd.f32 %v1686_v34, %v143_v40  ;;  %v221_v53 = vadd.f32 %v1688_v35, %v143_v40 }
 0x223   :  { %v148_v44 = vpop.permute.xlu0 %147 }
 0x224   :  { %v223_v56 = vadd.f32 %v1693_v37, %v148_v44  ;;  %v225_v59 = vadd.f32 %v1695_v38, %v148_v44 }
 0x2ea   :  { %v474_v41 = vpop.f32.mrb[0].mxu1 }
 0x2eb   :  { %v475_v42 = vadd.f32 %v474_v41, %v424_v36  ;;  %v476_v43 = vpop.f32.mrb[1].mxu1 }
 0x2ec   :  { %v477_v47 = vadd.f32 %v476_v43, %v424_v36  ;;  %v478_v48 = vpop.f32.mrb[2].mxu1 }
 0x2ed   :  { %v483_v50 = vmax.f32 %v475_v42, 0.0  ;;  %v479_v51 = vadd.f32 %v478_v48, %v429_v39  ;;  %v480_v52 = vpop.f32.mrb[3].mxu1 }
 0x2ee   :  { %v484_v54 = vmax.f32 %v477_v47, 0.0  ;;  %v481_v55 = vadd.f32 %v480_v52, %v429_v39 }
 0x2ef   :  { %v487_v57 = vadd.f32 %v483_v50, %v219_v49  ;;  %v485_v58 = vmax.f32 %v479_v51, 0.0 }
 0x2f0   :  { %v488_v46 = vadd.f32 %v484_v54, %v221_v53  ;;  %v486_v60 = vmax.f32 %v481_v55, 0.0 }
 0x2f1   :  { %v1744_v61 = vmax.f32 %v487_v57, 0.0  ;;  %v489_v45 = vadd.f32 %v485_v58, %v223_v56 }
 0x2f2   :  { %v490_v62 = vadd.f32 %v486_v60, %v225_v59  ;;  %v1757_v37 = vmax.f32 %v488_v46, 0.0 }
 0x2f3   :  { %v1746_v34 = vmax.f32 %v489_v45, 0.0  ;;  %v1286_v63 = vpack.i.bf16 %v1744_v61, %v1531_v2  ;;  %v1301_v38 = vpack.i.bf16 %v1531_v2, %v1744_v61 }
 0x2f4   :  { %v1762_v20 = vmax.f32 %v490_v62, 0.0  ;;  %v1306_v23 = vpack.i.bf16 %v1757_v37, %v1531_v2  ;;  %v1326_v1 = vpack.i.bf16 %v1531_v2, %v1757_v37 }
 0x2f5   :  { %1287 = vrot.lane.b32.xlu1 %v1286_v63, %s1539_s12  ;;  %v1336_v35 = vpack.i.bf16 %v1746_v34, %v1531_v2  ;;  %v1351_v22 = vpack.i.bf16 %v1531_v2, %v1746_v34 }
 0x2f6   :  { %v1356_v0 = vpack.i.bf16 %v1762_v20, %v1531_v2  ;;  %v1386_v3 = vpack.i.bf16 %v1531_v2, %v1762_v20 }
 0x2f7   :  { %1337 = vrot.lane.b32.xlu0 %v1336_v35, %s1539_s12 }
 0x2f9   :  { %1292 = vrot.lane.b32.xlu1 %v1286_v63, %s1540_s13 }
 0x2fb   :  { %1342 = vrot.lane.b32.xlu0 %v1336_v35, %s1540_s13 }
 0x2fd   :  { %1297 = vrot.lane.b32.xlu1 %v1286_v63, %s1533_s17 }
 0x2ff   :  { %1347 = vrot.lane.b32.xlu0 %v1336_v35, %s1533_s17 }
 0x301   :  { %1302 = vrot.lane.b32.xlu1 %v1301_v38, %s1536_s19 }
 0x303   :  { %1352 = vrot.lane.b32.xlu0 %v1351_v22, %s1536_s19 }
 0x305   :  { %1307 = vrot.lane.b32.xlu1 %v1306_v23, %s1539_s12 }
 0x307   :  { %1357 = vrot.lane.b32.xlu0 %v1356_v0, %s1539_s12 }
 0x309   :  { %1312 = vrot.lane.b32.xlu1 %v1306_v23, %s1540_s13 }
 0x30b   :  { %1362 = vrot.lane.b32.xlu0 %v1356_v0, %s1540_s13 }
 0x30d   :  { %1317 = vrot.lane.b32.xlu1 %v1306_v23, %s1533_s17 }
 0x30f   :  { %1367 = vrot.lane.b32.xlu0 %v1356_v0, %s1533_s17 }
 0x311   :  { %1322 = vrot.lane.b32.xlu1 %v1301_v38, %s1541_s14 }
 0x313   :  { %1372 = vrot.lane.b32.xlu0 %v1351_v22, %s1541_s14 }
 0x315   :  { %1327 = vrot.lane.b32.xlu1 %v1326_v1, %s1536_s19 }
 0x317   :  { %1387 = vrot.lane.b32.xlu0 %v1386_v3, %s1536_s19 }
 0x319   :  { %1332 = vrot.lane.b32.xlu1 %v1326_v1, %s1541_s14 }
 0x31b   :  { %1392 = vrot.lane.b32.xlu0 %v1386_v3, %s1541_s14 }
 0x31d   :  { %1377 = vrot.lane.b32.xlu1 %v1326_v1, %s1542_s15 }
 0x31f   :  { %1397 = vrot.lane.b32.xlu0 %v1386_v3, %s1542_s15 }
 0x321   :  { %1382 = vrot.lane.b32.xlu1 %v1301_v38, %s1542_s15 }
 0x323   :  { %1402 = vrot.lane.b32.xlu0 %v1351_v22, %s1542_s15 }
 0x325   :  { %691 = vperm.xlu1 %1165, %v687_v4  }
 0x327   :  { %696 = vperm.xlu0 %1164, %v688_v5  }
 0x367   :  { %v1288_v6 = vpop.permute.xlu1 %1287 }
 0x368   :  { %v1290_v19 = vunpack.i.h.bf16 %v1288_v6  ;;  %v1289_v21 = vunpack.i.l.bf16 %v1288_v6 }
 0x369   :  { %v1338_v8 = vpop.permute.xlu0 %1337 }
 0x36a   :  { %v1340_v12 = vunpack.i.h.bf16 %v1338_v8  ;;  %v1339_v14 = vunpack.i.l.bf16 %v1338_v8  ;;  %v520_v40 = vsel %vm519_vm9, %v1289_v21, %v1290_v19  ;;  %v677_v19 = vpack.c.bf16 %v1746_v34, %v1744_v61 }
 0x36b   :  { %v1293_v13 = vpop.permute.xlu1 %1292 }
 0x36c   :  { %v521_v28 = vsel %vm519_vm9, %v1339_v14, %v1340_v12  ;;  %v1295_v41 = vunpack.i.h.bf16 %v1293_v13  ;;  %v1294_v42 = vunpack.i.l.bf16 %v1293_v13 }
 0x36d   :  { %v1343_v18 = vpop.permute.xlu0 %1342  ;;  %v671_v47 = vpack.c.bf16 %v521_v28, %v520_v40 }
 0x36e   :  { %v1345_v29 = vunpack.i.h.bf16 %v1343_v18  ;;  %v1344_v30 = vunpack.i.l.bf16 %v1343_v18  ;;  %v549_v58 = vsel %vm548_vm10, %v1294_v42, %v1295_v41  ;;  %v678_v18 = vpack.c.bf16 %v1762_v20, %v1757_v37 }
 0x36f   :  { %v1298_v24 = vpop.permute.xlu1 %1297 }
 0x370   :  { %v550_v50 = vsel %vm548_vm10, %v1344_v30, %v1345_v29  ;;  %v1300_v59 = vunpack.i.h.bf16 %v1298_v24  ;;  %v1299_v46 = vunpack.i.l.bf16 %v1298_v24 }
 0x371   :  { %v1348_v9 = vpop.permute.xlu0 %1347  ;;  %v673_v62 = vpack.c.bf16 %v550_v50, %v549_v58 }
 0x372   :  { %v1350_v51 = vunpack.i.h.bf16 %v1348_v9  ;;  %v1349_v52 = vunpack.i.l.bf16 %v1348_v9  ;;  %v573_v1 = vsel %vm51_vm1, %v1299_v46, %v1300_v59 }
 0x373   :  { %v1798_v10 = vpop.permute.xlu1 %1302 }
 0x374   :  { %v574_v38 = vsel %vm51_vm1, %v1349_v52, %v1350_v51  ;;  %v1305_v12 = vunpack.i.h.bf16 %v1798_v10  ;;  %v1304_v14 = vunpack.i.l.bf16 %v1798_v10 }
 0x375   :  { %v1800_v11 = vpop.permute.xlu0 %1352  ;;  %v675_v5 = vpack.c.bf16 %v574_v38, %v573_v1 }
 0x376   :  { %v1355_v6 = vunpack.i.h.bf16 %v1800_v11  ;;  %v1354_v8 = vunpack.i.l.bf16 %v1800_v11  ;;  %v601_v10 = vsel %vm92_vm4, %v1304_v14, %v1305_v12 }
 0x377   :  { %v1308_v15 = vpop.permute.xlu1 %1307 }
 0x378   :  { %v1310_v16 = vunpack.i.h.bf16 %v1308_v15  ;;  %v1309_v17 = vunpack.i.l.bf16 %v1308_v15  ;;  %v602_v11 = vsel %vm92_vm4, %v1354_v8, %v1355_v6 }
 0x379   :  { %v1358_v25 = vpop.permute.xlu0 %1357 }
 0x37a   :  { %v1360_v26 = vunpack.i.h.bf16 %v1358_v25  ;;  %v1359_v27 = vunpack.i.l.bf16 %v1358_v25  ;;  %v536_v36 = vsel %vm519_vm9, %v1309_v17, %v1310_v16 }
 0x37b   :  { %v1313_v31 = vpop.permute.xlu1 %1312 }
 0x37c   :  { %v1315_v32 = vunpack.i.h.bf16 %v1313_v31  ;;  %v1314_v33 = vunpack.i.l.bf16 %v1313_v31  ;;  %v537_v39 = vsel %vm519_vm9, %v1359_v27, %v1360_v26 }
 0x37d   :  { %v1363_v43 = vpop.permute.xlu0 %1362  ;;  %v672_v44 = vpack.c.bf16 %v537_v39, %v536_v36  ;;  %v679_v39 = vpack.c.bf16 %v602_v11, %v601_v10 }
 0x37e   :  { %v1365_v48 = vunpack.i.h.bf16 %v1363_v43  ;;  %v1364_v49 = vunpack.i.l.bf16 %v1363_v43  ;;  %v561_v56 = vsel %vm548_vm10, %v1314_v33, %v1315_v32 }
 0x37f   :  { %v1318_v53 = vpop.permute.xlu1 %1317  ;;  %707 = vmatprep.subr.bf16.mxu0 %v672_v44 }
 0x380   :  { %v1320_v54 = vunpack.i.h.bf16 %v1318_v53  ;;  %v1319_v55 = vunpack.i.l.bf16 %v1318_v53  ;;  %708 = vmatpush1.bf16.msra.mxu0 %v671_v47  ;;  %v562_v57 = vsel %vm548_vm10, %v1364_v49, %v1365_v48 }
 0x381   :  { %v1368_v60 = vpop.permute.xlu0 %1367  ;;  %v674_v45 = vpack.c.bf16 %v562_v57, %v561_v56 }
 0x382   :  { %v1370_v63 = vunpack.i.h.bf16 %v1368_v60  ;;  %v1369_v35 = vunpack.i.l.bf16 %v1368_v60  ;;  %v585_v23 = vsel %vm51_vm1, %v1319_v55, %v1320_v54 }
 0x383   :  { %v1323_v22 = vpop.permute.xlu1 %1322  ;;  %709 = vmatprep.subr.bf16.mxu0 %v674_v45 }
 0x384   :  { %710 = vmatpush1.bf16.msra.mxu0 %v673_v62  ;;  %v586_v0 = vsel %vm51_vm1, %v1369_v35, %v1370_v63  ;;  %v1325_v31 = vunpack.i.h.bf16 %v1323_v22  ;;  %v1324_v32 = vunpack.i.l.bf16 %v1323_v22 }
 0x385   :  { %v1373_v3 = vpop.permute.xlu0 %1372  ;;  %v676_v4 = vpack.c.bf16 %v586_v0, %v585_v23  ;;  %v1529_v23 = vld [vmem:[%s1956_s1 + $0x18] sm:$0xff]  }
 0x386   :  { %v1375_v21 = vunpack.i.h.bf16 %v1373_v3  ;;  %v1374_v25 = vunpack.i.l.bf16 %v1373_v3  ;;  %v630_v50 = vsel %vm629_vm11, %v1324_v32, %v1325_v31 }
 0x387   :  { %v1328_v13 = vpop.permute.xlu1 %1327  ;;  %711 = vmatprep.subr.bf16.mxu0 %v676_v4 }
 0x388   :  { %v1330_v24 = vunpack.i.h.bf16 %v1328_v13  ;;  %v1329_v9 = vunpack.i.l.bf16 %v1328_v13  ;;  %712 = vmatpush1.bf16.msra.mxu0 %v675_v5  ;;  %v631_v42 = vsel %vm629_vm11, %v1374_v25, %v1375_v21 }
 0x389   :  { %v1388_v15 = vpop.permute.xlu0 %1387  ;;  %713 = vmatprep.subr.bf16.mxu0 %v678_v18  ;;  %v681_v53 = vpack.c.bf16 %v631_v42, %v630_v50 }
 0x38a   :  { %v1390_v16 = vunpack.i.h.bf16 %v1388_v15  ;;  %v1389_v17 = vunpack.i.l.bf16 %v1388_v15  ;;  %v617_v29 = vsel %vm92_vm4, %v1329_v9, %v1330_v24 }
 0x38b   :  { %v1333_v26 = vpop.permute.xlu1 %1332 }
 0x38c   :  { %v1335_v27 = vunpack.i.h.bf16 %v1333_v26  ;;  %v1334_v28 = vunpack.i.l.bf16 %v1333_v26  ;;  %714 = vmatpush1.bf16.msra.mxu0 %v677_v19  ;;  %v618_v30 = vsel %vm92_vm4, %v1389_v17, %v1390_v16 }
 0x38d   :  { %v1393_v33 = vpop.permute.xlu0 %1392  ;;  %v680_v36 = vpack.c.bf16 %v618_v30, %v617_v29  ;;  %v942_v29 = vld [vmem:[%s1957_s2 + $0x40] sm:$0xff]  ;;  %v1020_v30 = vld [vmem:[%s1957_s2 + $0x50] sm:$0xff] }
 0x38e   :  { %v1395_v40 = vunpack.i.h.bf16 %v1393_v33  ;;  %v1394_v41 = vunpack.i.l.bf16 %v1393_v33  ;;  %v642_v48 = vsel %vm629_vm11, %v1334_v28, %v1335_v27 }
 0x38f   :  { %v1378_v43 = vpop.permute.xlu1 %1377  ;;  %715 = vmatprep.subr.bf16.mxu0 %v680_v36 }
 0x390   :  { %v1380_v44 = vunpack.i.h.bf16 %v1378_v43  ;;  %v1379_v47 = vunpack.i.l.bf16 %v1378_v43  ;;  %716 = vmatpush1.bf16.msra.mxu0 %v679_v39  ;;  %v643_v49 = vsel %vm629_vm11, %v1394_v41, %v1395_v40 }
 0x391   :  { %v1398_v51 = vpop.permute.xlu0 %1397  ;;  %v682_v52 = vpack.c.bf16 %v643_v49, %v642_v48 }
 0x392   :  { %v1400_v54 = vunpack.i.h.bf16 %v1398_v51  ;;  %v1399_v55 = vunpack.i.l.bf16 %v1398_v51  ;;  %v667_v59 = vsel %vm654_vm12, %v1379_v47, %v1380_v44 }
 0x393   :  { %v1383_v56 = vpop.permute.xlu1 %1382  ;;  %717 = vmatprep.subr.bf16.mxu0 %v682_v52 }
 0x394   :  { %v1385_v57 = vunpack.i.h.bf16 %v1383_v56  ;;  %v1384_v58 = vunpack.i.l.bf16 %v1383_v56  ;;  %718 = vmatpush1.bf16.msra.mxu0 %v681_v53  ;;  %v668_v46 = vsel %vm654_vm12, %v1399_v55, %v1400_v54 }
 0x395   :  { %v1403_v60 = vpop.permute.xlu0 %1402  ;;  %v684_v45 = vpack.c.bf16 %v668_v46, %v667_v59 }
 0x396   :  { %v1405_v62 = vunpack.i.h.bf16 %v1403_v60  ;;  %v1404_v63 = vunpack.i.l.bf16 %v1403_v60  ;;  %v655_v35 = vsel %vm654_vm12, %v1384_v58, %v1385_v57 }
 0x397   :  { %719 = vmatprep.subr.bf16.mxu0 %v684_v45 }
 0x398   :  { %v656_v38 = vsel %vm654_vm12, %v1404_v63, %v1405_v62 }
 0x399   :  { %v683_v22 = vpack.c.bf16 %v656_v38, %v655_v35 }
 0x39b   :  { %720 = vmatpush1.bf16.msra.mxu0 %v683_v22 }
 0x39e   :  { %1087 = vmatmul.mubr.msk.bf16.vlgmr.msra.gmra.mrb[8].mxu0 %vm436_vm8, %v1529_v23 }
 0x39f   :  { %1062 = vmatprep.mubr.bf16.mxu0 %v1537_v7 }
 0x3a4   :  { %v692_v0 = vpop.permute.xlu1 %691 }
 0x3a6   :  { %v697_v5 = vpop.permute.xlu0 %696 }
 0x471   :  { %v741_v1 = vpop.f32.mrb[8].mxu0 }
 0x472   :  { %v742_v3 = vadd.f32 %v741_v1, %v692_v0  ;;  %v743_v4 = vpop.f32.mrb[9].mxu0 }
 0x473   :  { %v745_v6 = vpop.f32.mrb[10].mxu0  ;;  %v744_v9 = vadd.f32 %v743_v4, %v692_v0 }
 0x474   :  { %v1839_v8 = vmax.f32 %v742_v3, 0.0  ;;  %v746_v13 = vadd.f32 %v745_v6, %v697_v5  ;;  %v747_v18 = vpop.f32.mrb[11].mxu0 }
 0x475   :  { %v748_v24 = vadd.f32 %v747_v18, %v697_v5  ;;  %v1850_v16 = vmax.f32 %v744_v9, 0.0 }
 0x476   :  { %v1841_v12 = vmax.f32 %v746_v13, 0.0  ;;  %v1406_v14 = vpack.i.bf16 %v1839_v8, %v1531_v2  ;;  %v1421_v11 = vpack.i.bf16 %v1531_v2, %v1839_v8 }
 0x477   :  { %v1845_v15 = vmax.f32 %v748_v24, 0.0  ;;  %v1426_v25 = vpack.i.bf16 %v1850_v16, %v1531_v2  ;;  %v1446_v27 = vpack.i.bf16 %v1531_v2, %v1850_v16 }
 0x478   :  { %1407 = vrot.lane.b32.xlu1 %v1406_v14, %s1539_s12  ;;  %v1456_v7 = vpack.i.bf16 %v1841_v12, %v1531_v2  ;;  %v932_v19 = vpack.c.bf16 %v1841_v12, %v1839_v8  ;;  %v1471_v21 = vpack.i.bf16 %v1531_v2, %v1841_v12 }
 0x479   :  { %v933_v17 = vpack.c.bf16 %v1845_v15, %v1850_v16  ;;  %v1476_v26 = vpack.i.bf16 %v1845_v15, %v1531_v2  ;;  %v1506_v28 = vpack.i.bf16 %v1531_v2, %v1845_v15  ;;  %v943_v2 = vld [vmem:[%s1957_s2 + $0x48] sm:$0xff] }
 0x47a   :  { %1457 = vrot.lane.b32.xlu0 %v1456_v7, %s1539_s12 }
 0x47c   :  { %1412 = vrot.lane.b32.xlu1 %v1406_v14, %s1540_s13 }
 0x47e   :  { %1462 = vrot.lane.b32.xlu0 %v1456_v7, %s1540_s13 }
 0x480   :  { %1417 = vrot.lane.b32.xlu1 %v1406_v14, %s1533_s17 }
 0x482   :  { %1467 = vrot.lane.b32.xlu0 %v1456_v7, %s1533_s17 }
 0x484   :  { %1422 = vrot.lane.b32.xlu1 %v1421_v11, %s1536_s19 }
 0x486   :  { %1472 = vrot.lane.b32.xlu0 %v1471_v21, %s1536_s19 }
 0x488   :  { %1427 = vrot.lane.b32.xlu1 %v1426_v25, %s1539_s12 }
 0x48a   :  { %1477 = vrot.lane.b32.xlu0 %v1476_v26, %s1539_s12 }
 0x48c   :  { %1432 = vrot.lane.b32.xlu1 %v1426_v25, %s1540_s13 }
 0x48e   :  { %1482 = vrot.lane.b32.xlu0 %v1476_v26, %s1540_s13 }
 0x490   :  { %1437 = vrot.lane.b32.xlu1 %v1426_v25, %s1533_s17 }
 0x492   :  { %1487 = vrot.lane.b32.xlu0 %v1476_v26, %s1533_s17 }
 0x494   :  { %1442 = vrot.lane.b32.xlu1 %v1421_v11, %s1541_s14 }
 0x496   :  { %1492 = vrot.lane.b32.xlu0 %v1471_v21, %s1541_s14 }
 0x498   :  { %1447 = vrot.lane.b32.xlu1 %v1446_v27, %s1536_s19 }
 0x49a   :  { %1507 = vrot.lane.b32.xlu0 %v1506_v28, %s1536_s19 }
 0x49c   :  { %1452 = vrot.lane.b32.xlu1 %v1446_v27, %s1541_s14 }
 0x49e   :  { %1512 = vrot.lane.b32.xlu0 %v1506_v28, %s1541_s14 }
 0x4a0   :  { %1497 = vrot.lane.b32.xlu1 %v1446_v27, %s1542_s15 }
 0x4a2   :  { %1517 = vrot.lane.b32.xlu0 %v1506_v28, %s1542_s15 }
 0x4a4   :  { %1502 = vrot.lane.b32.xlu1 %v1421_v11, %s1542_s15 }
 0x4a6   :  { %1522 = vrot.lane.b32.xlu0 %v1471_v21, %s1542_s15 }
 0x4a8   :  { %946 = vperm.xlu1 %1165, %v942_v29  }
 0x4aa   :  { %951 = vperm.xlu0 %1164, %v943_v2  }
 0x4ac   :  { %1023 = vperm.xlu1 %1165, %v1020_v30  }
 0x4ea   :  { %v1408_v10 = vpop.permute.xlu1 %1407 }
 0x4eb   :  { %v1410_v49 = vunpack.i.h.bf16 %v1408_v10  ;;  %v1409_v50 = vunpack.i.l.bf16 %v1408_v10 }
 0x4ec   :  { %v1458_v31 = vpop.permute.xlu0 %1457 }
 0x4ed   :  { %v1460_v42 = vunpack.i.h.bf16 %v1458_v31  ;;  %v1459_v43 = vunpack.i.l.bf16 %v1458_v31  ;;  %v778_v45 = vsel %vm519_vm9, %v1409_v50, %v1410_v49 }
 0x4ee   :  { %v1413_v32 = vpop.permute.xlu1 %1412 }
 0x4ef   :  { %v779_v54 = vsel %vm519_vm9, %v1459_v43, %v1460_v42  ;;  %v1415_v62 = vunpack.i.h.bf16 %v1413_v32  ;;  %v1414_v63 = vunpack.i.l.bf16 %v1413_v32 }
 0x4f0   :  { %v1463_v33 = vpop.permute.xlu0 %1462  ;;  %v926_v22 = vpack.c.bf16 %v779_v54, %v778_v45 }
 0x4f1   :  { %v1465_v55 = vunpack.i.h.bf16 %v1463_v33  ;;  %v1464_v56 = vunpack.i.l.bf16 %v1463_v33  ;;  %v806_v9 = vsel %vm548_vm10, %v1414_v63, %v1415_v62 }
 0x4f2   :  { %v1418_v36 = vpop.permute.xlu1 %1417 }
 0x4f3   :  { %v807_v1 = vsel %vm548_vm10, %v1464_v56, %v1465_v55  ;;  %v1420_v14 = vunpack.i.h.bf16 %v1418_v36  ;;  %v1419_v7 = vunpack.i.l.bf16 %v1418_v36 }
 0x4f4   :  { %v1468_v39 = vpop.permute.xlu0 %1467  ;;  %v928_v25 = vpack.c.bf16 %v807_v1, %v806_v9 }
 0x4f5   :  { %v1470_v3 = vunpack.i.h.bf16 %v1468_v39  ;;  %v1469_v4 = vunpack.i.l.bf16 %v1468_v39  ;;  %v830_v10 = vsel %vm51_vm1, %v1419_v7, %v1420_v14 }
 0x4f6   :  { %v1900_v40 = vpop.permute.xlu1 %1422 }
 0x4f7   :  { %v831_v28 = vsel %vm51_vm1, %v1469_v4, %v1470_v3 }
 0x4f8   :  { %v1902_v41 = vpop.permute.xlu0 %1472  ;;  %v930_v33 = vpack.c.bf16 %v831_v28, %v830_v10 }
 0x4f9   :  { %v1475_v36 = vunpack.i.h.bf16 %v1902_v41  ;;  %v1474_v39 = vunpack.i.l.bf16 %v1902_v41 }
 0x4fa   :  { %v1428_v44 = vpop.permute.xlu1 %1427 }
 0x4fb   :  { %v1430_v47 = vunpack.i.h.bf16 %v1428_v44  ;;  %v1429_v48 = vunpack.i.l.bf16 %v1428_v44 }
 0x4fc   :  { %v1478_v51 = vpop.permute.xlu0 %1477 }
 0x4fd   :  { %v1480_v52 = vunpack.i.h.bf16 %v1478_v51  ;;  %v1479_v53 = vunpack.i.l.bf16 %v1478_v51  ;;  %v794_v46 = vsel %vm519_vm9, %v1429_v48, %v1430_v47  ;;  %v1425_v47 = vunpack.i.h.bf16 %v1900_v40 }
 0x4fe   :  { %v1433_v57 = vpop.permute.xlu1 %1432  ;;  %v1424_v48 = vunpack.i.l.bf16 %v1900_v40 }
 0x4ff   :  { %v1435_v58 = vunpack.i.h.bf16 %v1433_v57  ;;  %v1434_v59 = vunpack.i.l.bf16 %v1433_v57  ;;  %v795_v60 = vsel %vm519_vm9, %v1479_v53, %v1480_v52  ;;  %v859_v52 = vsel %vm92_vm4, %v1474_v39, %v1475_v36 }
 0x500   :  { %v1483_v35 = vpop.permute.xlu0 %1482  ;;  %v927_v38 = vpack.c.bf16 %v795_v60, %v794_v46  ;;  %v858_v15 = vsel %vm92_vm4, %v1424_v48, %v1425_v47 }
 0x501   :  { %v1485_v23 = vunpack.i.h.bf16 %v1483_v35  ;;  %v1484_v0 = vunpack.i.l.bf16 %v1483_v35  ;;  %v818_v18 = vsel %vm548_vm10, %v1434_v59, %v1435_v58  ;;  %v934_v46 = vpack.c.bf16 %v859_v52, %v858_v15 }
 0x502   :  { %v1438_v5 = vpop.permute.xlu1 %1437  ;;  %962 = vmatprep.subr.bf16.mxu1 %v927_v38 }
 0x503   :  { %v1440_v6 = vunpack.i.h.bf16 %v1438_v5  ;;  %v1439_v13 = vunpack.i.l.bf16 %v1438_v5  ;;  %963 = vmatpush1.bf16.msra.mxu1 %v926_v22  ;;  %v819_v24 = vsel %vm548_vm10, %v1484_v0, %v1485_v23 }
 0x504   :  { %v1488_v11 = vpop.permute.xlu0 %1487  ;;  %v929_v21 = vpack.c.bf16 %v819_v24, %v818_v18 }
 0x505   :  { %v1490_v26 = vunpack.i.h.bf16 %v1488_v11  ;;  %v1489_v27 = vunpack.i.l.bf16 %v1488_v11  ;;  %v842_v2 = vsel %vm51_vm1, %v1439_v13, %v1440_v6 }
 0x506   :  { %v1443_v29 = vpop.permute.xlu1 %1442  ;;  %964 = vmatprep.subr.bf16.mxu1 %v929_v21 }
 0x507   :  { %965 = vmatpush1.bf16.msra.mxu1 %v928_v25  ;;  %v843_v30 = vsel %vm51_vm1, %v1489_v27, %v1490_v26  ;;  %v1445_v16 = vunpack.i.h.bf16 %v1443_v29  ;;  %v1530_v26 = vld [vmem:[%s1956_s1 + $0x20] sm:$0xff]  }
 0x508   :  { %v1493_v31 = vpop.permute.xlu0 %1492  ;;  %v931_v32 = vpack.c.bf16 %v843_v30, %v842_v2 }
 0x509   :  { %v1495_v53 = vunpack.i.h.bf16 %v1493_v31  ;;  %v1494_v41 = vunpack.i.l.bf16 %v1493_v31 }
 0x50a   :  { %v1448_v42 = vpop.permute.xlu1 %1447  ;;  %966 = vmatprep.subr.bf16.mxu1 %v931_v32 }
 0x50b   :  { %v1450_v43 = vunpack.i.h.bf16 %v1448_v42  ;;  %v1449_v44 = vunpack.i.l.bf16 %v1448_v42  ;;  %967 = vmatpush1.bf16.msra.mxu1 %v930_v33  ;;  %v887_v62 = vsel %vm629_vm11, %v1494_v41, %v1495_v53 }
 0x50c   :  { %v1508_v49 = vpop.permute.xlu0 %1507  ;;  %968 = vmatprep.subr.bf16.mxu1 %v933_v17  ;;  %v1444_v17 = vunpack.i.l.bf16 %v1443_v29 }
 0x50d   :  { %v1510_v50 = vunpack.i.h.bf16 %v1508_v49  ;;  %v1509_v51 = vunpack.i.l.bf16 %v1508_v49  ;;  %v874_v40 = vsel %vm92_vm4, %v1449_v44, %v1450_v43 }
 0x50e   :  { %v1453_v54 = vpop.permute.xlu1 %1452  ;;  %v886_v38 = vsel %vm629_vm11, %v1444_v17, %v1445_v16 }
 0x50f   :  { %v1455_v55 = vunpack.i.h.bf16 %v1453_v54  ;;  %v1454_v56 = vunpack.i.l.bf16 %v1453_v54  ;;  %969 = vmatpush1.bf16.msra.mxu1 %v932_v19  ;;  %v875_v57 = vsel %vm92_vm4, %v1509_v51, %v1510_v50  ;;  %v936_v0 = vpack.c.bf16 %v887_v62, %v886_v38 }
 0x510   :  { %v1513_v58 = vpop.permute.xlu0 %1512  ;;  %v935_v59 = vpack.c.bf16 %v875_v57, %v874_v40 }
 0x511   :  { %v1515_v60 = vunpack.i.h.bf16 %v1513_v58  ;;  %v1514_v45 = vunpack.i.l.bf16 %v1513_v58  ;;  %v898_v12 = vsel %vm629_vm11, %v1454_v56, %v1455_v55 }
 0x512   :  { %v1498_v63 = vpop.permute.xlu1 %1497  ;;  %970 = vmatprep.subr.bf16.mxu1 %v935_v59 }
 0x513   :  { %v1500_v35 = vunpack.i.h.bf16 %v1498_v63  ;;  %v1499_v8 = vunpack.i.l.bf16 %v1498_v63  ;;  %971 = vmatpush1.bf16.msra.mxu1 %v934_v46  ;;  %v899_v19 = vsel %vm629_vm11, %v1514_v45, %v1515_v60 }
 0x514   :  { %v1518_v22 = vpop.permute.xlu0 %1517  ;;  %v937_v23 = vpack.c.bf16 %v899_v19, %v898_v12 }
 0x515   :  { %v1520_v1 = vunpack.i.h.bf16 %v1518_v22  ;;  %v1519_v3 = vunpack.i.l.bf16 %v1518_v22  ;;  %v922_v13 = vsel %vm654_vm12, %v1499_v8, %v1500_v35 }
 0x516   :  { %v1503_v4 = vpop.permute.xlu1 %1502  ;;  %972 = vmatprep.subr.bf16.mxu1 %v937_v23 }
 0x517   :  { %v1505_v5 = vunpack.i.h.bf16 %v1503_v4  ;;  %v1504_v6 = vunpack.i.l.bf16 %v1503_v4  ;;  %973 = vmatpush1.bf16.msra.mxu1 %v936_v0  ;;  %v923_v18 = vsel %vm654_vm12, %v1519_v3, %v1520_v1 }
 0x518   :  { %v1523_v24 = vpop.permute.xlu0 %1522  ;;  %v939_v9 = vpack.c.bf16 %v923_v18, %v922_v13 }
 0x519   :  { %v1525_v14 = vunpack.i.h.bf16 %v1523_v24  ;;  %v1524_v7 = vunpack.i.l.bf16 %v1523_v24  ;;  %v910_v11 = vsel %vm654_vm12, %v1504_v6, %v1505_v5 }
 0x51a   :  { %974 = vmatprep.subr.bf16.mxu1 %v939_v9 }
 0x51b   :  { %v911_v21 = vsel %vm654_vm12, %v1524_v7, %v1525_v14 }
 0x51c   :  { %v938_v25 = vpack.c.bf16 %v911_v21, %v910_v11 }
 0x51e   :  { %975 = vmatpush1.bf16.msra.mxu1 %v938_v25 }
 0x521   :  { %1089 = vmatmul.mubr.msk.bf16.vlgmr.msra.gmra.mrb[4].mxu1 %vm436_vm8, %v1530_v26 }
 0x527   :  { %v947_v27 = vpop.permute.xlu1 %946 }
 0x529   :  { %v952_v30 = vpop.permute.xlu0 %951 }
 0x5f4   :  { %v996_v28 = vpop.f32.mrb[4].mxu1 }
 0x5f5   :  { %v997_v29 = vadd.f32 %v996_v28, %v947_v27  ;;  %v998_v2 = vpop.f32.mrb[5].mxu1 }
 0x5f6   :  { %v999_v10 = vadd.f32 %v998_v2, %v947_v27  ;;  %v1000_v31 = vpop.f32.mrb[6].mxu1 }
 0x5f7   :  { %v1005_v32 = vmax.f32 %v997_v29, 0.0  ;;  %v1001_v33 = vadd.f32 %v1000_v31, %v952_v30  ;;  %v1002_v36 = vpop.f32.mrb[7].mxu1 }
 0x5f8   :  { %v1006_v39 = vmax.f32 %v999_v10, 0.0  ;;  %v1003_v42 = vadd.f32 %v1002_v36, %v952_v30 }
 0x5f9   :  { %v1009_v43 = vadd.f32 %v1005_v32, %v1744_v61  ;;  %v1007_v44 = vmax.f32 %v1001_v33, 0.0  ;;  %v1017_v61 = vld [vmem:[%s1956_s1 + $0x28] sm:$0xf] }
 0x5fa   :  { %v1010_v47 = vadd.f32 %v1006_v39, %v1757_v37  ;;  %v1008_v48 = vmax.f32 %v1003_v42, 0.0  ;;  %v1024_v37 = vpop.permute.xlu1 %1023 }
 0x5fb   :  { %v1011_v49 = vadd.f32 %v1007_v44, %v1746_v34  ;;  %v1013_v51 = vmax.f32 %v1009_v43, 0.0 }
 0x5fc   :  { %v1012_v50 = vadd.f32 %v1008_v48, %v1762_v20  ;;  %v1014_v53 = vmax.f32 %v1010_v47, 0.0 }
 0x5fd   :  { %v1015_v52 = vmax.f32 %v1011_v49, 0.0 }
 0x5fe   :  { %v1016_v41 = vmax.f32 %v1012_v50, 0.0 }
 0x5ff   :  { %v1018_v54 = vpack.c.bf16 %v1015_v52, %v1013_v51 }
 0x600   :  { %v1019_v55 = vpack.c.bf16 %v1016_v41, %v1014_v53 }
 0x602   :  { %1030 = vmatprep.subr.bf16.mxu0 %v1019_v55 }
 0x603   :  { %1031 = vmatpush1.bf16.msra.mxu0 %v1018_v54 }
 0x606   :  { %1090 = vmatmul.mubr.msk.bf16.vlgmr.msra.gmra.mrb[12].mxu0 %vm1026_vm13, %v1017_v61 }
 0x6d9   :  { %v1064_v56 = vpop.f32.mrb[12].mxu0 }
 0x6da   :  { %v1065_v40 = vadd.f32 %v1064_v56, %v1024_v37  ;;  %v1066_v34 = vpop.f32.mrb[13].mxu0 }
 0x6db   :  { %v1067_v57 = vadd.f32 %v1066_v34, %v1024_v37  ;;  %v1068_v20 = vpop.f32.mrb[14].mxu0 }
 0x6dc   :  { %1071 = vst [vmem:[%s1958_s3] sm:$0xff] %v1065_v40  ;;  %v1069_v15 = vpop.f32.mrb[15].mxu0 }
 0x6dd   :  { %1091 = vst [vmem:[%s1958_s3 + $0x8] sm:$0xff] %v1067_v57 }

</bundles_post_ra>
